<compile_context>
chip_gen: v5e
topology: v5e:2x2
jax: 0.10.0
libtpu: 0.0.40
codegen_flags: <defaults>
</compile_context>

<pallas_src>
import jax
import jax.numpy as jnp
from jax.experimental import pallas as pl
from jax.experimental.pallas import tpu as pltpu


def _round_up(x, m):
    return ((x + m - 1) // m) * m


def _softplus(x):
    # matches torch.nn.functional.softplus(beta=1, threshold=20)
    return jnp.where(x > 20.0, x, jnp.log1p(jnp.exp(jnp.minimum(x, 20.0))))


def cgcnn_conv_kernel(src_c_ref, dst_c_ref, dst_r_ref,        # edge indices (per tile)
                      x_ref, e_ref,
                      wsf_ref, wss_ref, wdf_ref, wds_ref, wef_ref, wes_ref,
                      scmf_ref, shmf_ref, scms_ref, shms_ref, scn_ref, shn_ref,
                      out_ref,
                      hsf, hss, hdf, hds, acc):
    t = pl.program_id(0)
    n_tiles = pl.num_programs(0)
    te = e_ref.shape[0]
    n_buf = acc.shape[0]

    # -- step 0: node linear layers (both gating halves) + zero the accumulator.
    @pl.when(t == 0)
    def _init():
        x = x_ref[...]
        hsf[...] = jnp.dot(x, wsf_ref[...], preferred_element_type=jnp.float32)
        hss[...] = jnp.dot(x, wss_ref[...], preferred_element_type=jnp.float32)
        hdf[...] = jnp.dot(x, wdf_ref[...], preferred_element_type=jnp.float32)
        hds[...] = jnp.dot(x, wds_ref[...], preferred_element_type=jnp.float32)
        acc[...] = jnp.zeros_like(acc)

    # -- gather (u_add_v) via one-hot MXU matmuls.  Padded edges have index -1
    #    -> all-zero one-hot row -> gathered value 0.
    node_iota_l = jax.lax.broadcasted_iota(jnp.int32, (te, n_buf), 1)   # nodes on lanes
    oh_src = (src_c_ref[...] == node_iota_l).astype(jnp.float32)        # [TE, n_buf]
    oh_dst = (dst_c_ref[...] == node_iota_l).astype(jnp.float32)        # [TE, n_buf]
    g_f = (jnp.dot(oh_src, hsf[...], preferred_element_type=jnp.float32)
           + jnp.dot(oh_dst, hdf[...], preferred_element_type=jnp.float32))
    g_s = (jnp.dot(oh_src, hss[...], preferred_element_type=jnp.float32)
           + jnp.dot(oh_dst, hds[...], preferred_element_type=jnp.float32))

    # -- edge linear + folded (biases + eval-mode BatchNorm) scale/shift + gating.
    e = e_ref[...]
    m_f = g_f + jnp.dot(e, wef_ref[...], preferred_element_type=jnp.float32)
    m_s = g_s + jnp.dot(e, wes_ref[...], preferred_element_type=jnp.float32)
    m_f = m_f * scmf_ref[...] + shmf_ref[...]
    m_s = m_s * scms_ref[...] + shms_ref[...]
    msg = jax.nn.sigmoid(m_f) * _softplus(m_s)                          # [TE, F]

    # -- scatter-sum of gated messages onto destination nodes via one-hot^T MXU
    #    matmul.  Padded edges (dst == -1) contribute an all-zero column.
    node_iota_s = jax.lax.broadcasted_iota(jnp.int32, (n_buf, te), 0)   # nodes on sublanes
    oh_dst_t = (dst_r_ref[...] == node_iota_s).astype(jnp.float32)      # [n_buf, TE]
    acc[...] += jnp.dot(oh_dst_t, msg, preferred_element_type=jnp.float32)

    # -- last step: node BatchNorm (folded) + residual + softplus.
    @pl.when(t == n_tiles - 1)
    def _finalize():
        h = acc[...] * scn_ref[...] + shn_ref[...]
        out_ref[...] = _softplus(x_ref[...] + h)


def cgcnn_conv(node_feats, edge_feats, src, dst, params, *, edge_tile=128):
    """CGCNNConv forward (eval-mode BatchNorm).

    node_feats [N, F] f32, edge_feats [E, Fe] f32, src/dst [E] int32.
    """
    N, F = node_feats.shape
    E, Fe = edge_feats.shape
    eps = 1e-5
    assert edge_tile % 128 == 0

    # Pad nodes to a sublane multiple; pad edges to a whole number of tiles.
    # Padded edge indices are -1 -> all-zero one-hot rows/cols (no contribution).
    n_buf = _round_up(max(N, 1), 8)
    e_pad = _round_up(max(E, 1), edge_tile)

    x_buf = jnp.zeros((n_buf, F), jnp.float32).at[:N].set(node_feats)
    e_buf = jnp.zeros((e_pad, Fe), jnp.float32).at[:E].set(edge_feats)
    src_p = jnp.full((e_pad,), -1, jnp.int32).at[:E].set(src.astype(jnp.int32))
    dst_p = jnp.full((e_pad,), -1, jnp.int32).at[:E].set(dst.astype(jnp.int32))
    src_col = src_p.reshape(e_pad, 1)     # edges on sublanes (gather one-hot)
    dst_col = dst_p.reshape(e_pad, 1)
    dst_row = dst_p.reshape(1, e_pad)     # edges on lanes (scatter one-hot)

    # Fold eval-mode BatchNorm and all three linear biases into scale/shift.
    # TODO(synk): training-mode BatchNorm (batch statistics + running-stat update)
    # is not implemented; running statistics are folded as in eval().
    inv_m = params["gamma_m"] / jnp.sqrt(params["var_m"] + eps)
    b_tot = params["b_src"] + params["b_dst"] + params["b_edge"]
    scale_m = inv_m
    shift_m = params["beta_m"] + inv_m * (b_tot - params["mean_m"])
    inv_n = params["gamma_n"] / jnp.sqrt(params["var_n"] + eps)
    scale_n = inv_n.reshape(1, F)
    shift_n = (params["beta_n"] - params["mean_n"] * inv_n).reshape(1, F)

    # Split the 2F message channels into sigmoid ("f") / softplus ("s") halves.
    w_src_f, w_src_s = params["w_src"][:, :F], params["w_src"][:, F:]
    w_dst_f, w_dst_s = params["w_dst"][:, :F], params["w_dst"][:, F:]
    w_edge_f, w_edge_s = params["w_edge"][:, :F], params["w_edge"][:, F:]
    scm_f, scm_s = scale_m[:F].reshape(1, F), scale_m[F:].reshape(1, F)
    shm_f, shm_s = shift_m[:F].reshape(1, F), shift_m[F:].reshape(1, F)

    n_tiles = e_pad // edge_tile
    resident = lambda t: (0, 0)

    def full(shape):
        return pl.BlockSpec(shape, resident)

    in_specs = [
        pl.BlockSpec((edge_tile, 1), lambda t: (t, 0)),   # src (column layout)
        pl.BlockSpec((edge_tile, 1), lambda t: (t, 0)),   # dst (column layout)
        pl.BlockSpec((1, edge_tile), lambda t: (0, t)),   # dst (row layout)
        full((n_buf, F)),                                 # node features (resident)
        pl.BlockSpec((edge_tile, Fe), lambda t: (t, 0)),  # edge features (pipelined)
        full((F, F)), full((F, F)),                       # w_src halves
        full((F, F)), full((F, F)),                       # w_dst halves
        full((Fe, F)), full((Fe, F)),                     # w_edge halves
        full((1, F)), full((1, F)),                       # message scale/shift, f half
        full((1, F)), full((1, F)),                       # message scale/shift, s half
        full((1, F)), full((1, F)),                       # node scale/shift
    ]

    cost = pl.CostEstimate(
        flops=int(8 * n_buf * F * F + 10 * e_pad * n_buf * F
                  + 4 * e_pad * Fe * F + 12 * e_pad * F),
        transcendentals=int(3 * e_pad * F + n_buf * F),
        bytes_accessed=int(4 * (2 * n_buf * F + e_pad * Fe + 3 * e_pad
                                + 4 * F * F + 2 * Fe * F + 6 * F)),
    )

    out = pl.pallas_call(
        cgcnn_conv_kernel,
        out_shape=jax.ShapeDtypeStruct((n_buf, F), jnp.float32),
        grid_spec=pltpu.PrefetchScalarGridSpec(
            num_scalar_prefetch=0,
            grid=(n_tiles,),
            in_specs=in_specs,
            out_specs=pl.BlockSpec((n_buf, F), resident),
            scratch_shapes=[
                pltpu.VMEM((n_buf, F), jnp.float32),   # h_src, sigmoid half
                pltpu.VMEM((n_buf, F), jnp.float32),   # h_src, softplus half
                pltpu.VMEM((n_buf, F), jnp.float32),   # h_dst, sigmoid half
                pltpu.VMEM((n_buf, F), jnp.float32),   # h_dst, softplus half
                pltpu.VMEM((n_buf, F), jnp.float32),   # destination accumulator
            ],
        ),
        compiler_params=pltpu.CompilerParams(dimension_semantics=("arbitrary",)),
        cost_estimate=cost,
    )(src_col, dst_col, dst_row,
      x_buf, e_buf,
      w_src_f, w_src_s, w_dst_f, w_dst_s, w_edge_f, w_edge_s,
      scm_f, shm_f, scm_s, shm_s, scale_n, shift_n)
    return out[:N]


def cgcnn_conv_ref(node_feats, edge_feats, src, dst, params):
    """Pure-JAX reference mirroring the PyTorch forward (eval-mode BN)."""
    N, F = node_feats.shape
    eps = 1e-5
    h_src = node_feats @ params["w_src"] + params["b_src"]
    h_dst = node_feats @ params["w_dst"] + params["b_dst"]
    h_edge = edge_feats @ params["w_edge"] + params["b_edge"]
    m = h_src[src] + h_dst[dst] + h_edge
    m = (m - params["mean_m"]) / jnp.sqrt(params["var_m"] + eps) * params["gamma_m"] + params["beta_m"]
    h_f, h_s = m[:, :F], m[:, F:]
    msg = jax.nn.sigmoid(h_f) * _softplus(h_s)
    h = jax.ops.segment_sum(msg, dst, num_segments=N)
    h = (h - params["mean_n"]) / jnp.sqrt(params["var_n"] + eps) * params["gamma_n"] + params["beta_n"]
    return _softplus(node_feats + h)


if __name__ == "__main__":
    # module defaults node_features=64, edge_features=32; small deterministic graph
    N, E, F, Fe = 20, 200, 64, 32
    key = jax.random.PRNGKey(0)
    keys = jax.random.split(key, 18)

    node_feats = jax.random.normal(keys[0], (N, F), dtype=jnp.float32)
    edge_feats = jax.random.normal(keys[1], (E, Fe), dtype=jnp.float32)
    src = jax.random.randint(keys[2], (E,), 0, N, dtype=jnp.int32)
    dst = jax.random.randint(keys[3], (E,), 0, N, dtype=jnp.int32)

    s = 0.1
    params = {
        # linear weights stored as [in, out] (y = x @ W + b)
        "w_src": s * jax.random.normal(keys[4], (F, 2 * F), dtype=jnp.float32),
        "b_src": s * jax.random.normal(keys[5], (2 * F,), dtype=jnp.float32),
        "w_dst": s * jax.random.normal(keys[6], (F, 2 * F), dtype=jnp.float32),
        "b_dst": s * jax.random.normal(keys[7], (2 * F,), dtype=jnp.float32),
        "w_edge": s * jax.random.normal(keys[8], (Fe, 2 * F), dtype=jnp.float32),
        "b_edge": s * jax.random.normal(keys[9], (2 * F,), dtype=jnp.float32),
        # BatchNorm1d(2F) on messages (eval mode)
        "gamma_m": 1.0 + s * jax.random.normal(keys[10], (2 * F,), dtype=jnp.float32),
        "beta_m": s * jax.random.normal(keys[11], (2 * F,), dtype=jnp.float32),
        "mean_m": s * jax.random.normal(keys[12], (2 * F,), dtype=jnp.float32),
        "var_m": 1.0 + 0.2 * jax.random.uniform(keys[13], (2 * F,), dtype=jnp.float32),
        # BatchNorm1d(F) on aggregated node features (eval mode)
        "gamma_n": 1.0 + s * jax.random.normal(keys[14], (F,), dtype=jnp.float32),
        "beta_n": s * jax.random.normal(keys[15], (F,), dtype=jnp.float32),
        "mean_n": s * jax.random.normal(keys[16], (F,), dtype=jnp.float32),
        "var_n": 1.0 + 0.2 * jax.random.uniform(keys[17], (F,), dtype=jnp.float32),
    }

    # edge_tile=128 -> 2 edge tiles, exercises the multi-step accumulation path.
    out = cgcnn_conv(node_feats, edge_feats, src, dst, params, edge_tile=128)
    out = jax.block_until_ready(out)

    ref = cgcnn_conv_ref(node_feats, edge_feats, src, dst, params)
    assert out.shape == (N, F) and out.dtype == jnp.float32
    err = float(jnp.abs(out - ref).max())
    assert jnp.allclose(out, ref, atol=2e-3, rtol=2e-3), err

    print("KERNEL_OK")
</pallas_src>

<mosaic_0001>
module attributes {stable_mosaic.version = 11 : i64} {
  func.func @cgcnn_conv_kernel(%arg0: i32, %arg1: memref<128x1xi32, #tpu.memory_space<vmem>>, %arg2: memref<128x1xi32, #tpu.memory_space<vmem>>, %arg3: memref<1x128xi32, #tpu.memory_space<vmem>>, %arg4: memref<24x64xf32, #tpu.memory_space<vmem>>, %arg5: memref<128x32xf32, #tpu.memory_space<vmem>>, %arg6: memref<64x64xf32, #tpu.memory_space<vmem>>, %arg7: memref<64x64xf32, #tpu.memory_space<vmem>>, %arg8: memref<64x64xf32, #tpu.memory_space<vmem>>, %arg9: memref<64x64xf32, #tpu.memory_space<vmem>>, %arg10: memref<32x64xf32, #tpu.memory_space<vmem>>, %arg11: memref<32x64xf32, #tpu.memory_space<vmem>>, %arg12: memref<1x64xf32, #tpu.memory_space<vmem>>, %arg13: memref<1x64xf32, #tpu.memory_space<vmem>>, %arg14: memref<1x64xf32, #tpu.memory_space<vmem>>, %arg15: memref<1x64xf32, #tpu.memory_space<vmem>>, %arg16: memref<1x64xf32, #tpu.memory_space<vmem>>, %arg17: memref<1x64xf32, #tpu.memory_space<vmem>>, %arg18: memref<24x64xf32, #tpu.memory_space<vmem>>, %arg19: memref<24x64xf32, #tpu.memory_space<vmem>>, %arg20: memref<24x64xf32, #tpu.memory_space<vmem>>, %arg21: memref<24x64xf32, #tpu.memory_space<vmem>>, %arg22: memref<24x64xf32, #tpu.memory_space<vmem>>, %arg23: memref<24x64xf32, #tpu.memory_space<vmem>>) attributes {dimension_semantics = [#tpu.dimension_semantics<arbitrary>], iteration_bounds = array<i64: 2>, scalar_prefetch = 0 : i64, scratch_operands = 5 : i64, tpu.core_type = #tpu.core_type<tc>, window_params = [{transform_indices = @transform_0, window_bounds = array<i64: 128, 1>}, {transform_indices = @transform_1, window_bounds = array<i64: 128, 1>}, {transform_indices = @transform_2, window_bounds = array<i64: 1, 128>}, {pipeline_mode = #tpu.pipeline_mode<synchronous>, transform_indices = @transform_3, window_bounds = array<i64: 24, 64>}, {transform_indices = @transform_4, window_bounds = array<i64: 128, 32>}, {pipeline_mode = #tpu.pipeline_mode<synchronous>, transform_indices = @transform_5, window_bounds = array<i64: 64, 64>}, {pipeline_mode = #tpu.pipeline_mode<synchronous>, transform_indices = @transform_6, window_bounds = array<i64: 64, 64>}, {pipeline_mode = #tpu.pipeline_mode<synchronous>, transform_indices = @transform_7, window_bounds = array<i64: 64, 64>}, {pipeline_mode = #tpu.pipeline_mode<synchronous>, transform_indices = @transform_8, window_bounds = array<i64: 64, 64>}, {pipeline_mode = #tpu.pipeline_mode<synchronous>, transform_indices = @transform_9, window_bounds = array<i64: 32, 64>}, {pipeline_mode = #tpu.pipeline_mode<synchronous>, transform_indices = @transform_10, window_bounds = array<i64: 32, 64>}, {pipeline_mode = #tpu.pipeline_mode<synchronous>, transform_indices = @transform_11, window_bounds = array<i64: 1, 64>}, {pipeline_mode = #tpu.pipeline_mode<synchronous>, transform_indices = @transform_12, window_bounds = array<i64: 1, 64>}, {pipeline_mode = #tpu.pipeline_mode<synchronous>, transform_indices = @transform_13, window_bounds = array<i64: 1, 64>}, {pipeline_mode = #tpu.pipeline_mode<synchronous>, transform_indices = @transform_14, window_bounds = array<i64: 1, 64>}, {pipeline_mode = #tpu.pipeline_mode<synchronous>, transform_indices = @transform_15, window_bounds = array<i64: 1, 64>}, {pipeline_mode = #tpu.pipeline_mode<synchronous>, transform_indices = @transform_16, window_bounds = array<i64: 1, 64>}, {pipeline_mode = #tpu.pipeline_mode<synchronous>, transform_indices = @transform_17, window_bounds = array<i64: 24, 64>}]} {
    %c0_i32 = arith.constant 0 : i32
    %0 = arith.cmpi eq, %arg0, %c0_i32 : i32
    %1 = arith.extui %0 : i1 to i32
    %c0_i32_0 = arith.constant 0 : i32
    %2 = arith.cmpi ne, %1, %c0_i32_0 : i32
    scf.if %2 {
      %c0_42 = arith.constant 0 : index
      %c0_43 = arith.constant 0 : index
      %69 = vector.load %arg4[%c0_42, %c0_43] : memref<24x64xf32, #tpu.memory_space<vmem>>, vector<24x64xf32>
      %c0_44 = arith.constant 0 : index
      %c0_45 = arith.constant 0 : index
      %70 = vector.load %arg6[%c0_44, %c0_45] : memref<64x64xf32, #tpu.memory_space<vmem>>, vector<64x64xf32>
      %cst_46 = arith.constant dense<0.000000e+00> : vector<24x64xf32>
      %71 = tpu.matmul %69, %70, %cst_46 {dimension_numbers = #tpu.dot_dimension_numbers<[1], [0], [0], [1], [0, 0, 1, 1], [], []>} : vector<24x64xf32>, vector<64x64xf32>, vector<24x64xf32> -> vector<24x64xf32>
      %c0_47 = arith.constant 0 : index
      %c0_48 = arith.constant 0 : index
      %72 = vector.load %arg19[%c0_47, %c0_48] : memref<24x64xf32, #tpu.memory_space<vmem>>, vector<24x64xf32>
      tpu.vector_store %arg19[%c0_47, %c0_48], %71 {strides = array<i32>} : memref<24x64xf32, #tpu.memory_space<vmem>>, vector<24x64xf32>,
      %c0_49 = arith.constant 0 : index
      %c0_50 = arith.constant 0 : index
      %73 = vector.load %arg7[%c0_49, %c0_50] : memref<64x64xf32, #tpu.memory_space<vmem>>, vector<64x64xf32>
      %cst_51 = arith.constant dense<0.000000e+00> : vector<24x64xf32>
      %74 = tpu.matmul %69, %73, %cst_51 {dimension_numbers = #tpu.dot_dimension_numbers<[1], [0], [0], [1], [0, 0, 1, 1], [], []>} : vector<24x64xf32>, vector<64x64xf32>, vector<24x64xf32> -> vector<24x64xf32>
      %c0_52 = arith.constant 0 : index
      %c0_53 = arith.constant 0 : index
      %75 = vector.load %arg20[%c0_52, %c0_53] : memref<24x64xf32, #tpu.memory_space<vmem>>, vector<24x64xf32>
      tpu.vector_store %arg20[%c0_52, %c0_53], %74 {strides = array<i32>} : memref<24x64xf32, #tpu.memory_space<vmem>>, vector<24x64xf32>,
      %c0_54 = arith.constant 0 : index
      %c0_55 = arith.constant 0 : index
      %76 = vector.load %arg8[%c0_54, %c0_55] : memref<64x64xf32, #tpu.memory_space<vmem>>, vector<64x64xf32>
      %cst_56 = arith.constant dense<0.000000e+00> : vector<24x64xf32>
      %77 = tpu.matmul %69, %76, %cst_56 {dimension_numbers = #tpu.dot_dimension_numbers<[1], [0], [0], [1], [0, 0, 1, 1], [], []>} : vector<24x64xf32>, vector<64x64xf32>, vector<24x64xf32> -> vector<24x64xf32>
      %c0_57 = arith.constant 0 : index
      %c0_58 = arith.constant 0 : index
      %78 = vector.load %arg21[%c0_57, %c0_58] : memref<24x64xf32, #tpu.memory_space<vmem>>, vector<24x64xf32>
      tpu.vector_store %arg21[%c0_57, %c0_58], %77 {strides = array<i32>} : memref<24x64xf32, #tpu.memory_space<vmem>>, vector<24x64xf32>,
      %c0_59 = arith.constant 0 : index
      %c0_60 = arith.constant 0 : index
      %79 = vector.load %arg9[%c0_59, %c0_60] : memref<64x64xf32, #tpu.memory_space<vmem>>, vector<64x64xf32>
      %cst_61 = arith.constant dense<0.000000e+00> : vector<24x64xf32>
      %80 = tpu.matmul %69, %79, %cst_61 {dimension_numbers = #tpu.dot_dimension_numbers<[1], [0], [0], [1], [0, 0, 1, 1], [], []>} : vector<24x64xf32>, vector<64x64xf32>, vector<24x64xf32> -> vector<24x64xf32>
      %c0_62 = arith.constant 0 : index
      %c0_63 = arith.constant 0 : index
      %81 = vector.load %arg22[%c0_62, %c0_63] : memref<24x64xf32, #tpu.memory_space<vmem>>, vector<24x64xf32>
      tpu.vector_store %arg22[%c0_62, %c0_63], %80 {strides = array<i32>} : memref<24x64xf32, #tpu.memory_space<vmem>>, vector<24x64xf32>,
      %cst_64 = arith.constant 0.000000e+00 : f32
      %82 = vector.broadcast %cst_64 : f32 to vector<24x64xf32>
      %c0_65 = arith.constant 0 : index
      %c0_66 = arith.constant 0 : index
      %83 = vector.load %arg23[%c0_65, %c0_66] : memref<24x64xf32, #tpu.memory_space<vmem>>, vector<24x64xf32>
      tpu.vector_store %arg23[%c0_65, %c0_66], %82 {strides = array<i32>} : memref<24x64xf32, #tpu.memory_space<vmem>>, vector<24x64xf32>,
    } else {
    }
    %3 = tpu.iota {dimensions = array<i32: 1>} : vector<128x24xi32>
    %c0 = arith.constant 0 : index
    %c0_1 = arith.constant 0 : index
    %4 = vector.load %arg1[%c0, %c0_1] : memref<128x1xi32, #tpu.memory_space<vmem>>, vector<128x1xi32>
    %5 = vector.broadcast %4 : vector<128x1xi32> to vector<128x24xi32>
    %6 = arith.cmpi eq, %5, %3 : vector<128x24xi32>
    %7 = arith.extui %6 : vector<128x24xi1> to vector<128x24xi32>
    %8 = arith.sitofp %7 : vector<128x24xi32> to vector<128x24xf32>
    %c0_2 = arith.constant 0 : index
    %c0_3 = arith.constant 0 : index
    %9 = vector.load %arg2[%c0_2, %c0_3] : memref<128x1xi32, #tpu.memory_space<vmem>>, vector<128x1xi32>
    %10 = vector.broadcast %9 : vector<128x1xi32> to vector<128x24xi32>
    %11 = arith.cmpi eq, %10, %3 : vector<128x24xi32>
    %12 = arith.extui %11 : vector<128x24xi1> to vector<128x24xi32>
    %13 = arith.sitofp %12 : vector<128x24xi32> to vector<128x24xf32>
    %c0_4 = arith.constant 0 : index
    %c0_5 = arith.constant 0 : index
    %14 = vector.load %arg19[%c0_4, %c0_5] : memref<24x64xf32, #tpu.memory_space<vmem>>, vector<24x64xf32>
    %cst = arith.constant dense<0.000000e+00> : vector<128x64xf32>
    %15 = tpu.matmul %8, %14, %cst {dimension_numbers = #tpu.dot_dimension_numbers<[1], [0], [0], [1], [0, 0, 1, 1], [], []>} : vector<128x24xf32>, vector<24x64xf32>, vector<128x64xf32> -> vector<128x64xf32>
    %c0_6 = arith.constant 0 : index
    %c0_7 = arith.constant 0 : index
    %16 = vector.load %arg21[%c0_6, %c0_7] : memref<24x64xf32, #tpu.memory_space<vmem>>, vector<24x64xf32>
    %cst_8 = arith.constant dense<0.000000e+00> : vector<128x64xf32>
    %17 = tpu.matmul %13, %16, %cst_8 {dimension_numbers = #tpu.dot_dimension_numbers<[1], [0], [0], [1], [0, 0, 1, 1], [], []>} : vector<128x24xf32>, vector<24x64xf32>, vector<128x64xf32> -> vector<128x64xf32>
    %18 = arith.addf %15, %17 : vector<128x64xf32>
    %c0_9 = arith.constant 0 : index
    %c0_10 = arith.constant 0 : index
    %19 = vector.load %arg20[%c0_9, %c0_10] : memref<24x64xf32, #tpu.memory_space<vmem>>, vector<24x64xf32>
    %cst_11 = arith.constant dense<0.000000e+00> : vector<128x64xf32>
    %20 = tpu.matmul %8, %19, %cst_11 {dimension_numbers = #tpu.dot_dimension_numbers<[1], [0], [0], [1], [0, 0, 1, 1], [], []>} : vector<128x24xf32>, vector<24x64xf32>, vector<128x64xf32> -> vector<128x64xf32>
    %c0_12 = arith.constant 0 : index
    %c0_13 = arith.constant 0 : index
    %21 = vector.load %arg22[%c0_12, %c0_13] : memref<24x64xf32, #tpu.memory_space<vmem>>, vector<24x64xf32>
    %cst_14 = arith.constant dense<0.000000e+00> : vector<128x64xf32>
    %22 = tpu.matmul %13, %21, %cst_14 {dimension_numbers = #tpu.dot_dimension_numbers<[1], [0], [0], [1], [0, 0, 1, 1], [], []>} : vector<128x24xf32>, vector<24x64xf32>, vector<128x64xf32> -> vector<128x64xf32>
    %23 = arith.addf %20, %22 : vector<128x64xf32>
    %c0_15 = arith.constant 0 : index
    %c0_16 = arith.constant 0 : index
    %24 = vector.load %arg5[%c0_15, %c0_16] : memref<128x32xf32, #tpu.memory_space<vmem>>, vector<128x32xf32>
    %c0_17 = arith.constant 0 : index
    %c0_18 = arith.constant 0 : index
    %25 = vector.load %arg10[%c0_17, %c0_18] : memref<32x64xf32, #tpu.memory_space<vmem>>, vector<32x64xf32>
    %cst_19 = arith.constant dense<0.000000e+00> : vector<128x64xf32>
    %26 = tpu.matmul %24, %25, %cst_19 {dimension_numbers = #tpu.dot_dimension_numbers<[1], [0], [0], [1], [0, 0, 1, 1], [], []>} : vector<128x32xf32>, vector<32x64xf32>, vector<128x64xf32> -> vector<128x64xf32>
    %27 = arith.addf %18, %26 : vector<128x64xf32>
    %c0_20 = arith.constant 0 : index
    %c0_21 = arith.constant 0 : index
    %28 = vector.load %arg11[%c0_20, %c0_21] : memref<32x64xf32, #tpu.memory_space<vmem>>, vector<32x64xf32>
    %cst_22 = arith.constant dense<0.000000e+00> : vector<128x64xf32>
    %29 = tpu.matmul %24, %28, %cst_22 {dimension_numbers = #tpu.dot_dimension_numbers<[1], [0], [0], [1], [0, 0, 1, 1], [], []>} : vector<128x32xf32>, vector<32x64xf32>, vector<128x64xf32> -> vector<128x64xf32>
    %30 = arith.addf %23, %29 : vector<128x64xf32>
    %c0_23 = arith.constant 0 : index
    %c0_24 = arith.constant 0 : index
    %31 = vector.load %arg12[%c0_23, %c0_24] : memref<1x64xf32, #tpu.memory_space<vmem>>, vector<1x64xf32>
    %32 = vector.broadcast %31 : vector<1x64xf32> to vector<128x64xf32>
    %33 = arith.mulf %27, %32 : vector<128x64xf32>
    %c0_25 = arith.constant 0 : index
    %c0_26 = arith.constant 0 : index
    %34 = vector.load %arg13[%c0_25, %c0_26] : memref<1x64xf32, #tpu.memory_space<vmem>>, vector<1x64xf32>
    %35 = vector.broadcast %34 : vector<1x64xf32> to vector<128x64xf32>
    %36 = arith.addf %33, %35 : vector<128x64xf32>
    %c0_27 = arith.constant 0 : index
    %c0_28 = arith.constant 0 : index
    %37 = vector.load %arg14[%c0_27, %c0_28] : memref<1x64xf32, #tpu.memory_space<vmem>>, vector<1x64xf32>
    %38 = vector.broadcast %37 : vector<1x64xf32> to vector<128x64xf32>
    %39 = arith.mulf %30, %38 : vector<128x64xf32>
    %c0_29 = arith.constant 0 : index
    %c0_30 = arith.constant 0 : index
    %40 = vector.load %arg15[%c0_29, %c0_30] : memref<1x64xf32, #tpu.memory_space<vmem>>, vector<1x64xf32>
    %41 = vector.broadcast %40 : vector<1x64xf32> to vector<128x64xf32>
    %42 = arith.addf %39, %41 : vector<128x64xf32>
    %43 = arith.negf %36 : vector<128x64xf32>
    %44 = math.exp %43 : vector<128x64xf32>
    %cst_31 = arith.constant 1.000000e+00 : f32
    %45 = vector.broadcast %cst_31 : f32 to vector<128x64xf32>
    %46 = arith.addf %45, %44 : vector<128x64xf32>
    %47 = arith.divf %45, %46 : vector<128x64xf32>
    %cst_32 = arith.constant 2.000000e+01 : f32
    %48 = vector.broadcast %cst_32 : f32 to vector<128x64xf32>
    %49 = arith.cmpf ogt, %42, %48 : vector<128x64xf32>
    %cst_33 = arith.constant 2.000000e+01 : f32
    %50 = vector.broadcast %cst_33 : f32 to vector<128x64xf32>
    %51 = arith.minimumf %42, %50 : vector<128x64xf32>
    %52 = math.exp %51 : vector<128x64xf32>
    %53 = math.log1p %52 : vector<128x64xf32>
    %54 = arith.select %49, %42, %53 : vector<128x64xi1>, vector<128x64xf32>
    %55 = arith.mulf %47, %54 : vector<128x64xf32>
    %56 = tpu.iota {dimensions = array<i32: 0>} : vector<24x128xi32>
    %c0_34 = arith.constant 0 : index
    %c0_35 = arith.constant 0 : index
    %57 = vector.load %arg3[%c0_34, %c0_35] : memref<1x128xi32, #tpu.memory_space<vmem>>, vector<1x128xi32>
    %58 = vector.broadcast %57 : vector<1x128xi32> to vector<24x128xi32>
    %59 = arith.cmpi eq, %58, %56 : vector<24x128xi32>
    %60 = arith.extui %59 : vector<24x128xi1> to vector<24x128xi32>
    %61 = arith.sitofp %60 : vector<24x128xi32> to vector<24x128xf32>
    %c0_36 = arith.constant 0 : index
    %c0_37 = arith.constant 0 : index
    %62 = vector.load %arg23[%c0_36, %c0_37] : memref<24x64xf32, #tpu.memory_space<vmem>>, vector<24x64xf32>
    %cst_38 = arith.constant dense<0.000000e+00> : vector<24x64xf32>
    %63 = tpu.matmul %61, %55, %cst_38 {dimension_numbers = #tpu.dot_dimension_numbers<[1], [0], [0], [1], [0, 0, 1, 1], [], []>} : vector<24x128xf32>, vector<128x64xf32>, vector<24x64xf32> -> vector<24x64xf32>
    %64 = arith.addf %62, %63 : vector<24x64xf32>
    %c0_39 = arith.constant 0 : index
    %c0_40 = arith.constant 0 : index
    %65 = vector.load %arg23[%c0_39, %c0_40] : memref<24x64xf32, #tpu.memory_space<vmem>>, vector<24x64xf32>
    tpu.vector_store %arg23[%c0_39, %c0_40], %64 {strides = array<i32>} : memref<24x64xf32, #tpu.memory_space<vmem>>, vector<24x64xf32>,
    %c1_i32 = arith.constant 1 : i32
    %66 = arith.cmpi eq, %arg0, %c1_i32 : i32
    %67 = arith.extui %66 : i1 to i32
    %c0_i32_41 = arith.constant 0 : i32
    %68 = arith.cmpi ne, %67, %c0_i32_41 : i32
    scf.if %68 {
      %c0_42 = arith.constant 0 : index
      %c0_43 = arith.constant 0 : index
      %69 = vector.load %arg23[%c0_42, %c0_43] : memref<24x64xf32, #tpu.memory_space<vmem>>, vector<24x64xf32>
      %c0_44 = arith.constant 0 : index
      %c0_45 = arith.constant 0 : index
      %70 = vector.load %arg16[%c0_44, %c0_45] : memref<1x64xf32, #tpu.memory_space<vmem>>, vector<1x64xf32>
      %71 = vector.broadcast %70 : vector<1x64xf32> to vector<24x64xf32>
      %72 = arith.mulf %69, %71 : vector<24x64xf32>
      %c0_46 = arith.constant 0 : index
      %c0_47 = arith.constant 0 : index
      %73 = vector.load %arg17[%c0_46, %c0_47] : memref<1x64xf32, #tpu.memory_space<vmem>>, vector<1x64xf32>
      %74 = vector.broadcast %73 : vector<1x64xf32> to vector<24x64xf32>
      %75 = arith.addf %72, %74 : vector<24x64xf32>
      %c0_48 = arith.constant 0 : index
      %c0_49 = arith.constant 0 : index
      %76 = vector.load %arg4[%c0_48, %c0_49] : memref<24x64xf32, #tpu.memory_space<vmem>>, vector<24x64xf32>
      %77 = arith.addf %76, %75 : vector<24x64xf32>
      %cst_50 = arith.constant 2.000000e+01 : f32
      %78 = vector.broadcast %cst_50 : f32 to vector<24x64xf32>
      %79 = arith.cmpf ogt, %77, %78 : vector<24x64xf32>
      %cst_51 = arith.constant 2.000000e+01 : f32
      %80 = vector.broadcast %cst_51 : f32 to vector<24x64xf32>
      %81 = arith.minimumf %77, %80 : vector<24x64xf32>
      %82 = math.exp %81 : vector<24x64xf32>
      %83 = math.log1p %82 : vector<24x64xf32>
      %84 = arith.select %79, %77, %83 : vector<24x64xi1>, vector<24x64xf32>
      %c0_52 = arith.constant 0 : index
      %c0_53 = arith.constant 0 : index
      %85 = vector.load %arg18[%c0_52, %c0_53] : memref<24x64xf32, #tpu.memory_space<vmem>>, vector<24x64xf32>
      tpu.vector_store %arg18[%c0_52, %c0_53], %84 {strides = array<i32>} : memref<24x64xf32, #tpu.memory_space<vmem>>, vector<24x64xf32>,
    } else {
    }
    return
  }
  func.func @transform_0(%arg0: i32) -> (i32, i32) {
    %c0_i32 = arith.constant 0 : i32
    %c0_i32_0 = arith.constant 0 : i32
    return %arg0, %c0_i32 : i32, i32
  }
  func.func @transform_1(%arg0: i32) -> (i32, i32) {
    %c0_i32 = arith.constant 0 : i32
    %c0_i32_0 = arith.constant 0 : i32
    return %arg0, %c0_i32 : i32, i32
  }
  func.func @transform_2(%arg0: i32) -> (i32, i32) {
    %c0_i32 = arith.constant 0 : i32
    %c0_i32_0 = arith.constant 0 : i32
    return %c0_i32, %arg0 : i32, i32
  }
  func.func @transform_3(%arg0: i32) -> (i32, i32) {
    %c0_i32 = arith.constant 0 : i32
    %c0_i32_0 = arith.constant 0 : i32
    %c0_i32_1 = arith.constant 0 : i32
    return %c0_i32, %c0_i32_0 : i32, i32
  }
  func.func @transform_4(%arg0: i32) -> (i32, i32) {
    %c0_i32 = arith.constant 0 : i32
    %c0_i32_0 = arith.constant 0 : i32
    return %arg0, %c0_i32 : i32, i32
  }
  func.func @transform_5(%arg0: i32) -> (i32, i32) {
    %c0_i32 = arith.constant 0 : i32
    %c0_i32_0 = arith.constant 0 : i32
    %c0_i32_1 = arith.constant 0 : i32
    return %c0_i32, %c0_i32_0 : i32, i32
  }
  func.func @transform_6(%arg0: i32) -> (i32, i32) {
    %c0_i32 = arith.constant 0 : i32
    %c0_i32_0 = arith.constant 0 : i32
    %c0_i32_1 = arith.constant 0 : i32
    return %c0_i32, %c0_i32_0 : i32, i32
  }
  func.func @transform_7(%arg0: i32) -> (i32, i32) {
    %c0_i32 = arith.constant 0 : i32
    %c0_i32_0 = arith.constant 0 : i32
    %c0_i32_1 = arith.constant 0 : i32
    return %c0_i32, %c0_i32_0 : i32, i32
  }
  func.func @transform_8(%arg0: i32) -> (i32, i32) {
    %c0_i32 = arith.constant 0 : i32
    %c0_i32_0 = arith.constant 0 : i32
    %c0_i32_1 = arith.constant 0 : i32
    return %c0_i32, %c0_i32_0 : i32, i32
  }
  func.func @transform_9(%arg0: i32) -> (i32, i32) {
    %c0_i32 = arith.constant 0 : i32
    %c0_i32_0 = arith.constant 0 : i32
    %c0_i32_1 = arith.constant 0 : i32
    return %c0_i32, %c0_i32_0 : i32, i32
  }
  func.func @transform_10(%arg0: i32) -> (i32, i32) {
    %c0_i32 = arith.constant 0 : i32
    %c0_i32_0 = arith.constant 0 : i32
    %c0_i32_1 = arith.constant 0 : i32
    return %c0_i32, %c0_i32_0 : i32, i32
  }
  func.func @transform_11(%arg0: i32) -> (i32, i32) {
    %c0_i32 = arith.constant 0 : i32
    %c0_i32_0 = arith.constant 0 : i32
    %c0_i32_1 = arith.constant 0 : i32
    return %c0_i32, %c0_i32_0 : i32, i32
  }
  func.func @transform_12(%arg0: i32) -> (i32, i32) {
    %c0_i32 = arith.constant 0 : i32
    %c0_i32_0 = arith.constant 0 : i32
    %c0_i32_1 = arith.constant 0 : i32
    return %c0_i32, %c0_i32_0 : i32, i32
  }
  func.func @transform_13(%arg0: i32) -> (i32, i32) {
    %c0_i32 = arith.constant 0 : i32
    %c0_i32_0 = arith.constant 0 : i32
    %c0_i32_1 = arith.constant 0 : i32
    return %c0_i32, %c0_i32_0 : i32, i32
  }
  func.func @transform_14(%arg0: i32) -> (i32, i32) {
    %c0_i32 = arith.constant 0 : i32
    %c0_i32_0 = arith.constant 0 : i32
    %c0_i32_1 = arith.constant 0 : i32
    return %c0_i32, %c0_i32_0 : i32, i32
  }
  func.func @transform_15(%arg0: i32) -> (i32, i32) {
    %c0_i32 = arith.constant 0 : i32
    %c0_i32_0 = arith.constant 0 : i32
    %c0_i32_1 = arith.constant 0 : i32
    return %c0_i32, %c0_i32_0 : i32, i32
  }
  func.func @transform_16(%arg0: i32) -> (i32, i32) {
    %c0_i32 = arith.constant 0 : i32
    %c0_i32_0 = arith.constant 0 : i32
    %c0_i32_1 = arith.constant 0 : i32
    return %c0_i32, %c0_i32_0 : i32, i32
  }
  func.func @transform_17(%arg0: i32) -> (i32, i32) {
    %c0_i32 = arith.constant 0 : i32
    %c0_i32_0 = arith.constant 0 : i32
    %c0_i32_1 = arith.constant 0 : i32
    return %c0_i32, %c0_i32_0 : i32, i32
  }
}

</mosaic_0001>

<bundles_post_ra>
// kernel: tpu_custom_call.1
= control target key start
LH: loop header
LB: loop body
LE: loop exit
PB: predicated region body
PF: predicated region fallthrough
CT: control target
= control target key end

     0   :  { %s4339_s0 = inlined_call_operand.vmem [shape: s32[256,1], index: 0, kind: input, shape index: {}]   ;;  %s4340_s1 = inlined_call_operand.vmem [shape: s32[256,1], index: 1, kind: input, shape index: {}]   ;;  %s4341_s2 = inlined_call_operand.vmem [shape: s32[1,256], index: 2, kind: input, shape index: {}]   ;;  %s4342_s3 = inlined_call_operand.vmem [shape: f32[24,64], index: 3, kind: input, shape index: {}]   ;;  %s4343_s4 = inlined_call_operand.vmem [shape: f32[256,32], index: 4, kind: input, shape index: {}]   ;;  %s4344_s5 = inlined_call_operand.vmem [shape: f32[64,64], index: 5, kind: input, shape index: {}]   ;;  %s4345_s6 = inlined_call_operand.vmem [shape: f32[64,64], index: 6, kind: input, shape index: {}]   ;;  %s4346_s7 = inlined_call_operand.vmem [shape: f32[64,64], index: 7, kind: input, shape index: {}]   ;;  %s4347_s8 = inlined_call_operand.vmem [shape: f32[64,64], index: 8, kind: input, shape index: {}]   ;;  %s4348_s9 = inlined_call_operand.vmem [shape: f32[32,64], index: 9, kind: input, shape index: {}]   ;;  %s4349_s10 = inlined_call_operand.vmem [shape: f32[32,64], index: 10, kind: input, shape index: {}]   ;;  %s4350_s11 = inlined_call_operand.vmem [shape: f32[1,64], index: 11, kind: input, shape index: {}]   ;;  %s4351_s12 = inlined_call_operand.vmem [shape: f32[1,64], index: 12, kind: input, shape index: {}]   ;;  %s4352_s13 = inlined_call_operand.vmem [shape: f32[1,64], index: 13, kind: input, shape index: {}]   ;;  %s4353_s14 = inlined_call_operand.vmem [shape: f32[1,64], index: 14, kind: input, shape index: {}]   ;;  %s4354_s15 = inlined_call_operand.vmem [shape: f32[1,64], index: 15, kind: input, shape index: {}]   ;;  %s4355_s16 = inlined_call_operand.vmem [shape: f32[1,64], index: 16, kind: input, shape index: {}]   ;;  %s4356_s17 = inlined_call_operand.hbm [shape: f32[24,64], index: 17, kind: output, shape index: {}]  }
   0x1   :  { %4408 = sst [smem:[#allocation44_spill]] %s4339_s0 }
   0x2   :  { %4409 = sst [smem:[#allocation45_spill]] %s4340_s1 }
   0x3   :  { %4410 = sst [smem:[#allocation46_spill]] %s4354_s15 }
   0x4   :  { %4411 = sst [smem:[#allocation47_spill]] %s4355_s16 }
   0x5   :  { %4412 = sst [smem:[#allocation48_spill]] %s4356_s17 }
   0x6   :  { %22 = vsyncpa [#allocation8], 0  ;;  %s2918_s24 = smov 0  }
   0x7 LB: > { %4413 = sst [smem:[#allocation10_spill]] %s2819_s24  ;;  %s2924_s25 = sadd.s32 4294967295, %s2819_s24   ;;  %s2819_s24 = sphi %s2918_s24, %s28_s24  }
   0x8   : > { %p2426_p0 = scmp.ge.s32.totalorder %s2819_s24, 1  ;;  %p514_p1 = scmp.lt.s32.totalorder %s2819_s24, 3 }
   0xa   : > { %p515_p2 = pnand %p2426_p0, %p514_p1 }
   0xc   : > { %518 = sbr.rel (%p515_p2) target bundleno = 953 (0x3b9), region = 88 }
  0x11   : > { %s2427_s26 = sshll.u32 %s2924_s25, 4  ;;  %p586_p3 = scmp.lt.s32.totalorder %s2924_s25, 1 }
  0x12   : > { %p575_p4 = scmp.lt.s32.totalorder %s2427_s26, 31  ;;  %s4414_s1 = sld [smem:[#allocation44_spill]] }
  0x13   : > { %s2931_s27 = scalar_select %p586_p3, %s2924_s25, 1 }
  0x14   : > { %s4569_s26 = smov (!%p575_p4, %s2427_s26), 31  ;;  %s4415_s23 = sld [smem:[#allocation45_spill]] }
  0x15   : > { %s588_s0 = scalar_lea.vmem %s4341_s2, %s2931_s27  ;;  %s2428_s30 = sshll.u32 %s4569_s26, 3 }
  0x16   : > { %s2950_s15 = scalar_lea.vmem %s4343_s4, %s2428_s30  ;;  %p2433_p5 = scmp.ne.s32.totalorder %s2924_s25, 0 }
  0x18   : > { %s2940_s20 = scalar_lea.vmem %s4414_s1, %s2428_s30  ;;  %598 = sbr.rel (%p2433_p5) target bundleno = 195 (0xc3), region = 92 }
  0x1a   : > { %s2945_s24 = scalar_lea.vmem %s4415_s23, %s2428_s30 }
  0x1d   : > { %v693_v0 = vld [vmem:[%s4346_s7 + $0x38] sm:$0xff]  ;;  %v692_v2 = vld [vmem:[%s4346_s7 + $0x30] sm:$0xff]  ;;  %vm610_vm0 = vcmask 523264   ;;  %v691_v4 = vld [vmem:[%s4346_s7 + $0x28] sm:$0xff]  ;;  %v2821_v5 = vmov 0.0  }
  0x1e   : > { %v730_v1 = vld [vmem:[%s4347_s8 + $0x38] sm:$0xff]  ;;  %702 = vmatpush.msra.mxu2 %v693_v0  ;;  %v729_v3 = vld [vmem:[%s4347_s8 + $0x30] sm:$0xff]  ;;  %760 = vst.msk [vmem:[#allocation6] sm:$0xff] %vm610_vm0, %v2821_v5  ;;  %v728_v6 = vld [vmem:[%s4347_s8 + $0x28] sm:$0xff] }
  0x1f   : > { %739 = vmatpush.msra.mxu3 %v730_v1  ;;  %v609_v7 = vld [vmem:[%s4344_s5 + $0x38] sm:$0xff]  ;;  %761 = vst.msk [vmem:[#allocation6 + $0x8] sm:$0xff] %vm610_vm0, %v2821_v5  ;;  %v608_v9 = vld [vmem:[%s4344_s5 + $0x30] sm:$0xff]  ;;  %v690_v11 = vld [vmem:[%s4346_s7 + $0x20] sm:$0xff] }
  0x20   : > { %v656_v8 = vld [vmem:[%s4345_s6 + $0x38] sm:$0xff]  ;;  %703 = vmatpush.msra.mxu2 %v692_v2  ;;  %v655_v10 = vld [vmem:[%s4345_s6 + $0x30] sm:$0xff]  ;;  %762 = vst.msk [vmem:[#allocation6 + $0x10] sm:$0xff] %vm610_vm0, %v2821_v5  ;;  %628 = vmatpush.msra.mxu0 %v609_v7  ;;  %v727_v12 = vld [vmem:[%s4347_s8 + $0x20] sm:$0xff] }
  0x21   : > { %740 = vmatpush.msra.mxu3 %v729_v3  ;;  %665 = vmatpush.msra.mxu1 %v656_v8  ;;  %v607_v13 = vld [vmem:[%s4344_s5 + $0x28] sm:$0xff]  ;;  %v689_v15 = vld [vmem:[%s4346_s7 + $0x18] sm:$0xff]  ;;  %v606_v17 = vld [vmem:[%s4344_s5 + $0x20] sm:$0xff] }
  0x22   : > { %704 = vmatpush.msra.mxu2 %v691_v4  ;;  %v654_v14 = vld [vmem:[%s4345_s6 + $0x28] sm:$0xff]  ;;  %629 = vmatpush.msra.mxu0 %v608_v9  ;;  %v726_v16 = vld [vmem:[%s4347_s8 + $0x18] sm:$0xff]  ;;  %v653_v18 = vld [vmem:[%s4345_s6 + $0x20] sm:$0xff] }
  0x23   : > { %741 = vmatpush.msra.mxu3 %v728_v6  ;;  %666 = vmatpush.msra.mxu1 %v655_v10  ;;  %v688_v19 = vld [vmem:[%s4346_s7 + $0x10] sm:$0xff]  ;;  %v605_v21 = vld [vmem:[%s4344_s5 + $0x18] sm:$0xff]  ;;  %v687_v23 = vld [vmem:[%s4346_s7 + $0x8] sm:$0xff] }
  0x24   : > { %705 = vmatpush.msra.mxu2 %v690_v11  ;;  %630 = vmatpush.msra.mxu0 %v607_v13  ;;  %v725_v20 = vld [vmem:[%s4347_s8 + $0x10] sm:$0xff]  ;;  %v652_v22 = vld [vmem:[%s4345_s6 + $0x18] sm:$0xff]  ;;  %v724_v24 = vld [vmem:[%s4347_s8 + $0x8] sm:$0xff] }
  0x25   : > { %742 = vmatpush.msra.mxu3 %v727_v12  ;;  %667 = vmatpush.msra.mxu1 %v654_v14  ;;  %v604_v25 = vld [vmem:[%s4344_s5 + $0x10] sm:$0xff]  ;;  %v686_v27 = vld [vmem:[%s4346_s7] sm:$0xff]  ;;  %v603_v30 = vld [vmem:[%s4344_s5 + $0x8] sm:$0xff] }
  0x26   : > { %706 = vmatpush.msra.mxu2 %v689_v15  ;;  %631 = vmatpush.msra.mxu0 %v606_v17  ;;  %v651_v26 = vld [vmem:[%s4345_s6 + $0x10] sm:$0xff]  ;;  %v723_v28 = vld [vmem:[%s4347_s8] sm:$0xff]  ;;  %v650_v31 = vld [vmem:[%s4345_s6 + $0x8] sm:$0xff] }
  0x27   : > { %743 = vmatpush.msra.mxu3 %v726_v16  ;;  %668 = vmatpush.msra.mxu1 %v653_v18  ;;  %v599_v29 = vld [vmem:[%s4342_s3] sm:$0xff]  ;;  %v600_v34 = vld [vmem:[%s4342_s3 + $0x8] sm:$0xff]  ;;  %v601_v35 = vld [vmem:[%s4342_s3 + $0x10] sm:$0xff] }
  0x28   : > { %707 = vmatpush.msra.mxu2 %v688_v19  ;;  %632 = vmatpush.msra.mxu0 %v605_v21  ;;  %v602_v32 = vld [vmem:[%s4344_s5] sm:$0xff] }
  0x29   : > { %744 = vmatpush.msra.mxu3 %v725_v20  ;;  %669 = vmatpush.msra.mxu1 %v652_v22  ;;  %v649_v33 = vld [vmem:[%s4345_s6] sm:$0xff] }
  0x2a   : > { %708 = vmatpush.msra.mxu2 %v687_v23  ;;  %633 = vmatpush.msra.mxu0 %v604_v25 }
  0x2b   : > { %745 = vmatpush.msra.mxu3 %v724_v24  ;;  %670 = vmatpush.msra.mxu1 %v651_v26 }
  0x2c   : > { %709 = vmatpush.msra.mxu2 %v686_v27  ;;  %634 = vmatpush.msra.mxu0 %v603_v30 }
  0x2d   : > { %746 = vmatpush.msra.mxu3 %v723_v28  ;;  %2440 = vmatmul.msk.f32.vlgmr.msra.gmra.mxu2 %vm610_vm0, %v599_v29 }
  0x2e   : > { %2443 = vmatmul.msk.f32.vlgmr.msra.gmra.mxu3 %vm610_vm0, %v599_v29  ;;  %671 = vmatpush.msra.mxu1 %v650_v31 }
  0x2f   : > { %635 = vmatpush.msra.mxu0 %v602_v32 }
  0x30   : > { %672 = vmatpush.msra.mxu1 %v649_v33  ;;  %2434 = vmatmul.msk.f32.vlgmr.msra.gmra.mxu0 %vm610_vm0, %v599_v29 }
  0x31   : > { %2437 = vmatmul.msk.f32.vlgmr.msra.gmra.mxu1 %vm610_vm0, %v599_v29 }
  0x35   : > { %2441 = vmatmul.msk.f32.gmra.mxu2 %vm610_vm0, %v600_v34 }
  0x36   : > { %2444 = vmatmul.msk.f32.gmra.mxu3 %vm610_vm0, %v600_v34 }
  0x38   : > { %2435 = vmatmul.msk.f32.gmra.mxu0 %vm610_vm0, %v600_v34 }
  0x39   : > { %2438 = vmatmul.msk.f32.gmra.mxu1 %vm610_vm0, %v600_v34 }
  0x3d   : > { %2442 = vmatmul.msk.f32.gmra.mxu2 %vm610_vm0, %v601_v35 }
  0x3e   : > { %2445 = vmatmul.msk.f32.gmra.mxu3 %vm610_vm0, %v601_v35 }
  0x40   : > { %2436 = vmatmul.msk.f32.gmra.mxu0 %vm610_vm0, %v601_v35 }
  0x41   : > { %2439 = vmatmul.msk.f32.gmra.mxu1 %vm610_vm0, %v601_v35 }
  0xad   : > { %v637_v36 = vpop.f32.mrf.mxu0 }
  0xae   : > { %v674_v37 = vpop.f32.mrf.mxu1  ;;  %646 = vst.msk [vmem:[#allocation2] sm:$0xff] %vm610_vm0, %v637_v36 }
  0xaf   : > { %683 = vst.msk [vmem:[#allocation3] sm:$0xff] %vm610_vm0, %v674_v37 }
  0xb0   : > { %v711_v38 = vpop.f32.mrf.mxu2 }
  0xb1   : > { %v748_v39 = vpop.f32.mrf.mxu3  ;;  %720 = vst.msk [vmem:[#allocation4] sm:$0xff] %vm610_vm0, %v711_v38 }
  0xb2   : > { %757 = vst.msk [vmem:[#allocation5] sm:$0xff] %vm610_vm0, %v748_v39 }
  0xb5   : > { %v640_v40 = vpop.f32.mrf.mxu0 }
  0xb6   : > { %v677_v41 = vpop.f32.mrf.mxu1  ;;  %647 = vst.msk [vmem:[#allocation2 + $0x8] sm:$0xff] %vm610_vm0, %v640_v40 }
  0xb7   : > { %684 = vst.msk [vmem:[#allocation3 + $0x8] sm:$0xff] %vm610_vm0, %v677_v41 }
  0xb8   : > { %v714_v42 = vpop.f32.mrf.mxu2 }
  0xb9   : > { %v751_v43 = vpop.f32.mrf.mxu3  ;;  %721 = vst.msk [vmem:[#allocation4 + $0x8] sm:$0xff] %vm610_vm0, %v714_v42 }
  0xba   : > { %758 = vst.msk [vmem:[#allocation5 + $0x8] sm:$0xff] %vm610_vm0, %v751_v43 }
  0xbd   : > { %v643_v44 = vpop.f32.mrf.mxu0 }
  0xbe   : > { %v680_v45 = vpop.f32.mrf.mxu1  ;;  %648 = vst.msk [vmem:[#allocation2 + $0x10] sm:$0xff] %vm610_vm0, %v643_v44 }
  0xbf   : > { %685 = vst.msk [vmem:[#allocation3 + $0x10] sm:$0xff] %vm610_vm0, %v680_v45 }
  0xc0   : > { %v717_v46 = vpop.f32.mrf.mxu2 }
  0xc1   : > { %v754_v47 = vpop.f32.mrf.mxu3  ;;  %722 = vst.msk [vmem:[#allocation4 + $0x10] sm:$0xff] %vm610_vm0, %v717_v46 }
  0xc2   : > { %759 = vst.msk [vmem:[#allocation5 + $0x10] sm:$0xff] %vm610_vm0, %v754_v47 }
  0xc3 PF: > { %v886_v48 = vld [vmem:[%s2945_s24 + $0x48] sm:$0xff]  ;;  %v877_v49 = vld [vmem:[%s2945_s24] sm:$0xff]  ;;  %v2822_v51 = vmov 0   ;;  %v887_v53 = vld [vmem:[%s2945_s24 + $0x50] sm:$0xff]  ;;  %v4358_v25 = vlaneseq  ;;  %v2823_v28 = vmov 0.0   ;;  %vm995_vm2 = vcmask 195584  }
  0xc4   : > { %v766_v50 = vld [vmem:[%s2940_s20 + $0x8] sm:$0xff]  ;;  %2633 = vset.pattern.permute.xlu2 %v2822_v51  ;;  %2632 = vset.pattern.permute.xlu1 %v2822_v51  ;;  %v765_v54 = vld [vmem:[%s2940_s20] sm:$0xff]  ;;  %v767_v55 = vld [vmem:[%s2940_s20 + $0x10] sm:$0xff]  ;;  %p2596_p6 = scmp.ne.s32.totalorder %s2924_s25, 1 }
  0xc5   : > { %2631 = vset.pattern.permute.xlu0 %v2822_v51  ;;  %921 = vperm.xlu1 %2632, %v886_v48   ;;  %v878_v52 = vld [vmem:[%s2945_s24 + $0x8] sm:$0xff]  ;;  %v879_v57 = vld [vmem:[%s2945_s24 + $0x10] sm:$0xff]  ;;  %v880_v58 = vld [vmem:[%s2945_s24 + $0x18] sm:$0xff]  ;;  %v3118_v26 = vand.u32 127, %v4358_v25  ;;  %s4564_s17 = sld [smem:[#allocation46_spill]] (!%p2596_p6) }
  0xc6   : > { %894 = vperm.xlu0 %2631, %v877_v49   ;;  %785 = vperm.xlu2 %2633, %v766_v50   ;;  %v774_v56 = vld [vmem:[%s2940_s20 + $0x48] sm:$0xff]  ;;  %v768_v59 = vld [vmem:[%s2940_s20 + $0x18] sm:$0xff]  ;;  %v889_v61 = vld [vmem:[%s2945_s24 + $0x60] sm:$0xff] }
  0xc7   : > { %v888_v60 = vld [vmem:[%s2945_s24 + $0x58] sm:$0xff]  ;;  %v881_v62 = vld [vmem:[%s2945_s24 + $0x20] sm:$0xff]  ;;  %v775_v63 = vld [vmem:[%s2940_s20 + $0x50] sm:$0xff] }
  0xc8   : > { %v776_v0 = vld [vmem:[%s2940_s20 + $0x58] sm:$0xff]  ;;  %v890_v1 = vld [vmem:[%s2945_s24 + $0x68] sm:$0xff]  ;;  %v769_v2 = vld [vmem:[%s2940_s20 + $0x20] sm:$0xff] }
  0xc9   : > { %v770_v3 = vld [vmem:[%s2940_s20 + $0x28] sm:$0xff]  ;;  %v777_v4 = vld [vmem:[%s2940_s20 + $0x60] sm:$0xff]  ;;  %v883_v6 = vld [vmem:[%s2945_s24 + $0x30] sm:$0xff] }
  0xca   : > { %v882_v5 = vld [vmem:[%s2945_s24 + $0x28] sm:$0xff]  ;;  %v771_v7 = vld [vmem:[%s2940_s20 + $0x30] sm:$0xff]  ;;  %v892_v9 = vld [vmem:[%s2945_s24 + $0x78] sm:$0xff] }
  0xcb   : > { %v891_v8 = vld [vmem:[%s2945_s24 + $0x70] sm:$0xff]  ;;  %v884_v10 = vld [vmem:[%s2945_s24 + $0x38] sm:$0xff]  ;;  %v778_v11 = vld [vmem:[%s2940_s20 + $0x68] sm:$0xff] }
  0xcc   : > { %v779_v12 = vld [vmem:[%s2940_s20 + $0x70] sm:$0xff]  ;;  %v780_v13 = vld [vmem:[%s2940_s20 + $0x78] sm:$0xff]  ;;  %v773_v15 = vld [vmem:[%s2940_s20 + $0x40] sm:$0xff] }
  0xcd   : > { %897 = vperm.xlu1 %2632, %v878_v52   ;;  %v772_v14 = vld [vmem:[%s2940_s20 + $0x38] sm:$0xff]  ;;  %v994_v16 = vld [vmem:[#allocation4 + $0x10] sm:$0xff]  ;;  %v992_v19 = vld [vmem:[#allocation4] sm:$0xff] }
  0xce   : > { %924 = vperm.xlu2 %2633, %v887_v53   ;;  %782 = vperm.xlu0 %2631, %v765_v54   ;;  %v993_v17 = vld [vmem:[#allocation4 + $0x8] sm:$0xff]  ;;  %v885_v18 = vld [vmem:[%s2945_s24 + $0x40] sm:$0xff]  ;;  %v991_v20 = vld [vmem:[#allocation2 + $0x10] sm:$0xff]  ;;  %s4565_s24 = sld [smem:[#allocation47_spill]] (!%p2596_p6) }
  0xcf   : > { %1057 = vmatpush.msra.mxu0 %v994_v16  ;;  %2601 = vmatpush.msra.mxu3 %v994_v16  ;;  %v990_v21 = vld [vmem:[#allocation2 + $0x8] sm:$0xff]  ;;  %v989_v22 = vld [vmem:[#allocation2] sm:$0xff] }
  0xd0   : > { %2604 = vmatpush.msra.mxu2 %v991_v20  ;;  %1170 = vmatpush.msra.mxu1 %v991_v20 }
  0xd1   : > { %1058 = vmatpush.msra.mxu0 %v993_v17  ;;  %2602 = vmatpush.msra.mxu3 %v993_v17  ;;  %v1509_v17 = vld [vmem:[%s4349_s10 + $0x8] sm:$0xff] }
  0xd2   : > { %2606 = vmatpush.msra.mxu2 %v990_v21  ;;  %1171 = vmatpush.msra.mxu1 %v990_v21 }
  0xd3   : > { %1059 = vmatpush.msra.mxu0 %v992_v19  ;;  %2603 = vmatpush.msra.mxu3 %v992_v19 }
  0xd4   : > { %2608 = vmatpush.msra.mxu2 %v989_v22  ;;  %1172 = vmatpush.msra.mxu1 %v989_v22 }
  0xd5   : > { %788 = vperm.xlu1 %2632, %v767_v55   ;;  %2605 = vmatpush.msrb.mxu3 %v991_v20  ;;  %v1374_v20 = vld [vmem:[%s4348_s9] sm:$0xff] }
  0xd6   : > { %809 = vperm.xlu2 %2633, %v774_v56   ;;  %900 = vperm.xlu0 %2631, %v879_v57  }
  0xd7   : > { %2607 = vmatpush.msrb.mxu3 %v990_v21 }
  0xd9   : > { %2609 = vmatpush.msrb.mxu3 %v989_v22 }
  0xdd   : > { %903 = vperm.xlu1 %2632, %v880_v58  }
  0xde   : > { %791 = vperm.xlu2 %2633, %v768_v59   ;;  %927 = vperm.xlu0 %2631, %v888_v60  }
  0xe5   : > { %930 = vperm.xlu1 %2632, %v889_v61  }
  0xe6   : > { %906 = vperm.xlu2 %2633, %v881_v62   ;;  %812 = vperm.xlu0 %2631, %v775_v63   ;;  %v1227_v63 = vld [vmem:[#allocation5 + $0x10] sm:$0xff] }
  0xe7   : > { %1241 = vmatpush.msrb.mxu2 %v1227_v63 }
  0xed   : > { %815 = vperm.xlu1 %2632, %v776_v0   ;;  %v1224_v0 = vld [vmem:[#allocation3 + $0x10] sm:$0xff] }
  0xee   : > { %933 = vperm.xlu2 %2633, %v890_v1   ;;  %794 = vperm.xlu0 %2631, %v769_v2   ;;  %v1226_v1 = vld [vmem:[#allocation5 + $0x8] sm:$0xff] }
  0xef   : > { %1242 = vmatpush.msrb.mxu2 %v1226_v1 }
  0xf5   : > { %797 = vperm.xlu1 %2632, %v770_v3  }
  0xf6   : > { %818 = vperm.xlu2 %2633, %v777_v4   ;;  %909 = vperm.xlu0 %2631, %v882_v5   ;;  %v1223_v5 = vld [vmem:[#allocation3 + $0x8] sm:$0xff] }
  0xfd   : > { %912 = vperm.xlu1 %2632, %v883_v6  }
  0xfe   : > { %800 = vperm.xlu2 %2633, %v771_v7   ;;  %936 = vperm.xlu0 %2631, %v891_v8   ;;  %v1225_v8 = vld [vmem:[#allocation5] sm:$0xff] }
  0xff   : > { %1243 = vmatpush.msrb.mxu2 %v1225_v8 }
 0x105   : > { %939 = vperm.xlu1 %2632, %v892_v9   ;;  %v1222_v9 = vld [vmem:[#allocation3] sm:$0xff] }
 0x106   : > { %915 = vperm.xlu2 %2633, %v884_v10   ;;  %821 = vperm.xlu0 %2631, %v778_v11   ;;  %v1377_v11 = vld [vmem:[%s4348_s9 + $0x18] sm:$0xff] }
 0x107   : > { %1439 = vmatpush.msrb.mxu0 %v1377_v11 }
 0x10d   : > { %824 = vperm.xlu1 %2632, %v779_v12   ;;  %v1511_v12 = vld [vmem:[%s4349_s10 + $0x18] sm:$0xff] }
 0x10e   : > { %827 = vperm.xlu2 %2633, %v780_v13   ;;  %803 = vperm.xlu0 %2631, %v772_v14   ;;  %v1376_v13 = vld [vmem:[%s4348_s9 + $0x10] sm:$0xff] }
 0x10f   : > { %v1510_v14 = vld [vmem:[%s4349_s10 + $0x10] sm:$0xff]  ;;  %1524 = vmatpush.msrb.mxu1 %v1511_v12  ;;  %1440 = vmatpush.msrb.mxu0 %v1376_v13 }
 0x110   : > { %v1368_v12 = vld [vmem:[%s2950_s15 + $0x50] sm:$0xff] }
 0x111   : > { %1525 = vmatpush.msrb.mxu1 %v1510_v14 }
 0x113   : > { %1526 = vmatpush.msrb.mxu1 %v1509_v17  ;;  %v1369_v17 = vld [vmem:[%s2950_s15 + $0x58] sm:$0xff] }
 0x115   : > { %806 = vperm.xlu1 %2632, %v773_v15   ;;  %v1375_v15 = vld [vmem:[%s4348_s9 + $0x8] sm:$0xff] }
 0x116   : > { %918 = vperm.xlu0 %2631, %v885_v18   ;;  %1441 = vmatpush.msrb.mxu0 %v1375_v15 }
 0x118   : > { %1442 = vmatpush.msrb.mxu0 %v1374_v20 }
 0x120   : > { %v786_v23 = vpop.permute.xlu2 %785 }
 0x121   : > { %vm830_vm8 = vcmp.eq.s32.totalorder %v786_v23, %v3118_v26  ;;  %v1508_v23 = vld [vmem:[%s4349_s10] sm:$0xff] }
 0x122   : > { %v3159_v42 = vsel %vm830_vm8, 1.0, %v2823_v28  ;;  %1527 = vmatpush.msrb.mxu1 %v1508_v23  ;;  %v1370_v23 = vld [vmem:[%s2950_s15 + $0x60] sm:$0xff] }
 0x128   : > { %v925_v24 = vpop.permute.xlu2 %924 }
 0x129   : > { %vm951_vm5 = vcmp.eq.s32.totalorder %v925_v24, %v3118_v26 }
 0x12a   : > { %v3141_v37 = vsel %vm951_vm5, 1.0, %v2823_v28 }
 0x130   : > { %v810_v27 = vpop.permute.xlu2 %809 }
 0x131   : > { %vm838_vm1 = vcmp.eq.s32.totalorder %v810_v27, %v3118_v26 }
 0x132   : > { %v3122_v29 = vsel %vm838_vm1, 1.0, %v2823_v28 }
 0x133   : > { %2503 = vmatmul.msk.f32.vlgmr.msra.gmra.mxu2 %vm995_vm2, %v3122_v29 }
 0x137   : > { %v922_v30 = vpop.permute.xlu1 %921 }
 0x138   : > { %vm950_vm3 = vcmp.eq.s32.totalorder %v922_v30, %v3118_v26  ;;  %v895_v31 = vpop.permute.xlu0 %894  ;;  %v792_v35 = vpop.permute.xlu2 %791 }
 0x139   : > { %v3128_v32 = vsel %vm950_vm3, 1.0, %v2823_v28  ;;  %vm941_vm4 = vcmp.eq.s32.totalorder %v895_v31, %v3118_v26  ;;  %vm832_vm14 = vcmp.eq.s32.totalorder %v792_v35, %v3118_v26 }
 0x13a   : > { %v3132_v33 = vsel %vm941_vm4, 1.0, %v2823_v28  ;;  %2487 = vmatmul.msk.f32.vlgmr.msra.gmra.mxu3 %vm995_vm2, %v3128_v32  ;;  %v3200_v56 = vsel %vm832_vm14, 1.0, %v2823_v28 }
 0x13b   : > { %2478 = vmatmul.msk.f32.vlgmr.msra.gmra.mxu0 %vm995_vm2, %v3132_v33  ;;  %1306 = vmatpush.msra.mxu3 %v1224_v0  ;;  %v1366_v0 = vld [vmem:[%s2950_s15 + $0x40] sm:$0xff] }
 0x13d   : > { %1307 = vmatpush.msra.mxu3 %v1223_v5 }
 0x13f   : > { %v898_v34 = vpop.permute.xlu1 %897  ;;  %1308 = vmatpush.msra.mxu3 %v1222_v9 }
 0x140   : > { %vm942_vm6 = vcmp.eq.s32.totalorder %v898_v34, %v3118_v26  ;;  %v783_v36 = vpop.permute.xlu0 %782  ;;  %v907_v43 = vpop.permute.xlu2 %906 }
 0x141   : > { %v3144_v38 = vsel %vm942_vm6, 1.0, %v2823_v28  ;;  %vm829_vm7 = vcmp.eq.s32.totalorder %v783_v36, %v3118_v26  ;;  %vm945_vm13 = vcmp.eq.s32.totalorder %v907_v43, %v3118_v26 }
 0x142   : > { %v3148_v39 = vsel %vm829_vm7, 1.0, %v2823_v28  ;;  %2488 = vmatmul.msk.f32.gmra.mxu3 %vm995_vm2, %v3141_v37  ;;  %v3194_v54 = vsel %vm945_vm13, 1.0, %v2823_v28 }
 0x143   : > { %2479 = vmatmul.msk.f32.gmra.mxu0 %vm995_vm2, %v3144_v38  ;;  %2494 = vmatmul.msk.f32.vlgmr.msra.gmra.mxu1 %vm995_vm2, %v3148_v39 }
 0x147   : > { %v789_v40 = vpop.permute.xlu1 %788 }
 0x148   : > { %v901_v41 = vpop.permute.xlu0 %900  ;;  %vm831_vm10 = vcmp.eq.s32.totalorder %v789_v40, %v3118_v26  ;;  %v934_v50 = vpop.permute.xlu2 %933 }
 0x149   : > { %vm943_vm9 = vcmp.eq.s32.totalorder %v901_v41, %v3118_v26  ;;  %v3178_v49 = vsel %vm831_vm10, 1.0, %v2823_v28  ;;  %vm954_vm1 = vcmp.eq.s32.totalorder %v934_v50, %v3118_v26 }
 0x14a   : > { %v3162_v44 = vsel %vm943_vm9, 1.0, %v2823_v28  ;;  %v3217_v61 = vsel %vm954_vm1, 1.0, %v2823_v28 }
 0x14b   : > { %2480 = vmatmul.msk.f32.gmra.mxu0 %vm995_vm2, %v3162_v44  ;;  %2495 = vmatmul.msk.f32.gmra.mxu1 %vm995_vm2, %v3159_v42 }
 0x14f   : > { %v904_v45 = vpop.permute.xlu1 %903 }
 0x150   : > { %vm944_vm11 = vcmp.eq.s32.totalorder %v904_v45, %v3118_v26  ;;  %v928_v46 = vpop.permute.xlu0 %927  ;;  %v819_v57 = vpop.permute.xlu2 %818 }
 0x151   : > { %v3171_v47 = vsel %vm944_vm11, 1.0, %v2823_v28  ;;  %vm952_vm12 = vcmp.eq.s32.totalorder %v928_v46, %v3118_v26  ;;  %vm841_vm5 = vcmp.eq.s32.totalorder %v819_v57, %v3118_v26 }
 0x152   : > { %v3175_v48 = vsel %vm952_vm12, 1.0, %v2823_v28  ;;  %v3238_v10 = vsel %vm841_vm5, 1.0, %v2823_v28 }
 0x153   : > { %2481 = vmatmul.msk.f32.gmra.mxu0 %vm995_vm2, %v3171_v47  ;;  %2489 = vmatmul.msk.f32.gmra.mxu3 %vm995_vm2, %v3175_v48 }
 0x154   : > { %2496 = vmatmul.msk.f32.gmra.mxu1 %vm995_vm2, %v3178_v49 }
 0x157   : > { %v931_v51 = vpop.permute.xlu1 %930 }
 0x158   : > { %vm953_vm15 = vcmp.eq.s32.totalorder %v931_v51, %v3118_v26  ;;  %v813_v52 = vpop.permute.xlu0 %812  ;;  %v801_v3 = vpop.permute.xlu2 %800 }
 0x159   : > { %v3190_v53 = vsel %vm953_vm15, 1.0, %v2823_v28  ;;  %vm839_vm0 = vcmp.eq.s32.totalorder %v813_v52, %v3118_v26  ;;  %vm835_vm8 = vcmp.eq.s32.totalorder %v801_v3, %v3118_v26 }
 0x15a   : > { %v3197_v55 = vsel %vm839_vm0, 1.0, %v2823_v28  ;;  %v3280_v24 = vsel %vm835_vm8, 1.0, %v2823_v28 }
 0x15b   : > { %2482 = vmatmul.msk.f32.gmra.mxu0 %vm995_vm2, %v3194_v54  ;;  %2490 = vmatmul.msk.f32.gmra.mxu3 %vm995_vm2, %v3190_v53 }
 0x15c   : > { %2497 = vmatmul.msk.f32.gmra.mxu1 %vm995_vm2, %v3200_v56  ;;  %2504 = vmatmul.msk.f32.gmra.mxu2 %vm995_vm2, %v3197_v55 }
 0x15f   : > { %v816_v58 = vpop.permute.xlu1 %815 }
 0x160   : > { %vm840_vm3 = vcmp.eq.s32.totalorder %v816_v58, %v3118_v26  ;;  %v795_v59 = vpop.permute.xlu0 %794  ;;  %v916_v21 = vpop.permute.xlu2 %915  ;;  %v1358_v58 = vld [vmem:[%s2950_s15] sm:$0xff] }
 0x161   : > { %v3213_v60 = vsel %vm840_vm3, 1.0, %v2823_v28  ;;  %vm833_vm4 = vcmp.eq.s32.totalorder %v795_v59, %v3118_v26  ;;  %vm948_vm11 = vcmp.eq.s32.totalorder %v916_v21, %v3118_v26  ;;  %v1365_v59 = vld [vmem:[%s2950_s15 + $0x38] sm:$0xff] }
 0x162   : > { %v3220_v62 = vsel %vm833_vm4, 1.0, %v2823_v28  ;;  %v3295_v34 = vsel %vm948_vm11, 1.0, %v2823_v28  ;;  %vm1378_vm4 = vcmask 261120  }
 0x163   : > { %2491 = vmatmul.msk.f32.gmra.mxu3 %vm995_vm2, %v3217_v61 }
 0x164   : > { %2498 = vmatmul.msk.f32.gmra.mxu1 %vm995_vm2, %v3220_v62  ;;  %2505 = vmatmul.msk.f32.gmra.mxu2 %vm995_vm2, %v3213_v60 }
 0x167   : > { %v798_v2 = vpop.permute.xlu1 %797 }
 0x168   : > { %vm834_vm6 = vcmp.eq.s32.totalorder %v798_v2, %v3118_v26  ;;  %v910_v4 = vpop.permute.xlu0 %909  ;;  %v828_v36 = vpop.permute.xlu2 %827 }
 0x169   : > { %v3231_v6 = vsel %vm834_vm6, 1.0, %v2823_v28  ;;  %vm946_vm7 = vcmp.eq.s32.totalorder %v910_v4, %v3118_v26  ;;  %vm844_vm14 = vcmp.eq.s32.totalorder %v828_v36, %v3118_v26 }
 0x16a   : > { %v3235_v7 = vsel %vm946_vm7, 1.0, %v2823_v28  ;;  %v3313_v45 = vsel %vm844_vm14, 1.0, %v2823_v28 }
 0x16b   : > { %2483 = vmatmul.msk.f32.gmra.mxu0 %vm995_vm2, %v3235_v7 }
 0x16c   : > { %2499 = vmatmul.msk.f32.gmra.mxu1 %vm995_vm2, %v3231_v6  ;;  %2506 = vmatmul.msk.f32.gmra.mxu2 %vm995_vm2, %v3238_v10 }
 0x16f   : > { %v913_v16 = vpop.permute.xlu1 %912 }
 0x170   : > { %vm947_vm9 = vcmp.eq.s32.totalorder %v913_v16, %v3118_v26  ;;  %v937_v18 = vpop.permute.xlu0 %936 }
 0x171   : > { %v3267_v19 = vsel %vm947_vm9, 1.0, %v2823_v28  ;;  %vm955_vm10 = vcmp.eq.s32.totalorder %v937_v18, %v3118_v26 }
 0x172   : > { %v3274_v22 = vsel %vm955_vm10, 1.0, %v2823_v28 }
 0x173   : > { %2484 = vmatmul.msk.f32.gmra.mxu0 %vm995_vm2, %v3267_v19  ;;  %2492 = vmatmul.msk.f32.gmra.mxu3 %vm995_vm2, %v3274_v22 }
 0x174   : > { %2500 = vmatmul.msk.f32.gmra.mxu1 %vm995_vm2, %v3280_v24 }
 0x177   : > { %v940_v27 = vpop.permute.xlu1 %939 }
 0x178   : > { %vm956_vm12 = vcmp.eq.s32.totalorder %v940_v27, %v3118_v26  ;;  %v822_v30 = vpop.permute.xlu0 %821 }
 0x179   : > { %v3291_v31 = vsel %vm956_vm12, 1.0, %v2823_v28  ;;  %vm842_vm13 = vcmp.eq.s32.totalorder %v822_v30, %v3118_v26 }
 0x17a   : > { %v3298_v35 = vsel %vm842_vm13, 1.0, %v2823_v28 }
 0x17b   : > { %2485 = vmatmul.msk.f32.gmra.mxu0 %vm995_vm2, %v3295_v34  ;;  %2493 = vmatmul.msk.f32.gmra.mxu3 %vm995_vm2, %v3291_v31 }
 0x17c   : > { %2507 = vmatmul.msk.f32.gmra.mxu2 %vm995_vm2, %v3298_v35 }
 0x17f   : > { %v825_v40 = vpop.permute.xlu1 %824 }
 0x180   : > { %vm843_vm15 = vcmp.eq.s32.totalorder %v825_v40, %v3118_v26  ;;  %v804_v41 = vpop.permute.xlu0 %803 }
 0x181   : > { %v3309_v43 = vsel %vm843_vm15, 1.0, %v2823_v28  ;;  %vm836_vm0 = vcmp.eq.s32.totalorder %v804_v41, %v3118_v26 }
 0x182   : > { %v2453_v46 = vsel %vm836_vm0, 1.0, %v2823_v28 }
 0x183   : > { %2501 = vmatmul.msk.f32.gmra.mxu1 %vm995_vm2, %v2453_v46  ;;  %2509 = vmatmul.msk.f32.vlgmr.msrb.gmra.mxu3 %vm995_vm2, %v3313_v45 }
 0x184   : > { %2508 = vmatmul.msk.f32.gmra.mxu2 %vm995_vm2, %v3309_v43 }
 0x187   : > { %v807_v50 = vpop.permute.xlu1 %806 }
 0x188   : > { %vm837_vm1 = vcmp.eq.s32.totalorder %v807_v50, %v3118_v26  ;;  %v919_v51 = vpop.permute.xlu0 %918 }
 0x189   : > { %v2454_v52 = vsel %vm837_vm1, 1.0, %v2823_v28  ;;  %vm949_vm3 = vcmp.eq.s32.totalorder %v919_v51, %v3118_v26  ;;  %v1359_v26 = vld [vmem:[%s2950_s15 + $0x8] sm:$0xff] }
 0x18a   : > { %v2470_v57 = vsel %vm949_vm3, 1.0, %v2823_v28  ;;  %v1360_v28 = vld [vmem:[%s2950_s15 + $0x10] sm:$0xff] }
 0x18b   : > { %2486 = vmatmul.msk.f32.gmra.mxu0 %vm995_vm2, %v2470_v57  ;;  %2502 = vmatmul.msk.f32.gmra.mxu1 %vm995_vm2, %v2454_v52 }
 0x18c   : > { %2510 = vmatmul.msk.f32.vlgmr.msrb.gmra.mxu2 %vm995_vm2, %v3132_v33  ;;  %2526 = vmatmul.msk.f32.vlgmr.msra.gmra.mxu3 %vm995_vm2, %v3148_v39  ;;  %v1361_v33 = vld [vmem:[%s2950_s15 + $0x18] sm:$0xff] }
 0x193   : > { %2542 = vmatmul.msk.f32.vlgmr.msrb.gmra.mxu0 %vm1378_vm4, %v1358_v58  ;;  %2558 = vmatmul.msk.f32.vlgmr.msrb.gmra.mxu1 %vm1378_vm4, %v1358_v58 }
 0x194   : > { %2511 = vmatmul.msk.f32.gmra.mxu2 %vm995_vm2, %v3144_v38  ;;  %2527 = vmatmul.msk.f32.gmra.mxu3 %vm995_vm2, %v3159_v42  ;;  %v1362_v38 = vld [vmem:[%s2950_s15 + $0x20] sm:$0xff]  ;;  %v1363_v42 = vld [vmem:[%s2950_s15 + $0x28] sm:$0xff] }
 0x19b   : > { %2543 = vmatmul.msk.f32.gmra.mxu0 %vm1378_vm4, %v1359_v26  ;;  %2559 = vmatmul.msk.f32.gmra.mxu1 %vm1378_vm4, %v1359_v26 }
 0x19c   : > { %2512 = vmatmul.msk.f32.gmra.mxu2 %vm995_vm2, %v3162_v44  ;;  %2528 = vmatmul.msk.f32.gmra.mxu3 %vm995_vm2, %v3178_v49 }
 0x1a3   : > { %2544 = vmatmul.msk.f32.gmra.mxu0 %vm1378_vm4, %v1360_v28  ;;  %2560 = vmatmul.msk.f32.gmra.mxu1 %vm1378_vm4, %v1360_v28 }
 0x1a4   : > { %2513 = vmatmul.msk.f32.gmra.mxu2 %vm995_vm2, %v3171_v47  ;;  %2529 = vmatmul.msk.f32.gmra.mxu3 %vm995_vm2, %v3200_v56  ;;  %v1364_v47 = vld [vmem:[%s2950_s15 + $0x30] sm:$0xff] }
 0x1ab   : > { %2545 = vmatmul.msk.f32.gmra.mxu0 %vm1378_vm4, %v1361_v33  ;;  %2561 = vmatmul.msk.f32.gmra.mxu1 %vm1378_vm4, %v1361_v33 }
 0x1ac   : > { %2514 = vmatmul.msk.f32.gmra.mxu2 %vm995_vm2, %v3194_v54  ;;  %2530 = vmatmul.msk.f32.gmra.mxu3 %vm995_vm2, %v3220_v62 }
 0x1b3   : > { %2546 = vmatmul.msk.f32.gmra.mxu0 %vm1378_vm4, %v1362_v38  ;;  %2562 = vmatmul.msk.f32.gmra.mxu1 %vm1378_vm4, %v1362_v38 }
 0x1b4   : > { %2515 = vmatmul.msk.f32.gmra.mxu2 %vm995_vm2, %v3235_v7  ;;  %2531 = vmatmul.msk.f32.gmra.mxu3 %vm995_vm2, %v3231_v6  ;;  %v1367_v6 = vld [vmem:[%s2950_s15 + $0x48] sm:$0xff] }
 0x1b6   : > { %v3401_v5 = vpop.f32.mrf.mxu2 }
 0x1b8   : > { %v3366_v39 = vpop.f32.mrf.mxu0 }
 0x1bb   : > { %2547 = vmatmul.msk.f32.gmra.mxu0 %vm1378_vm4, %v1363_v42  ;;  %2563 = vmatmul.msk.f32.gmra.mxu1 %vm1378_vm4, %v1363_v42 }
 0x1bc   : > { %2516 = vmatmul.msk.f32.gmra.mxu2 %vm995_vm2, %v3267_v19  ;;  %2532 = vmatmul.msk.f32.gmra.mxu3 %vm995_vm2, %v3280_v24 }
 0x1bd   : > { %v3383_v54 = vpop.f32.mrf.mxu3 }
 0x1c0   : > { %v3375_v44 = vpop.f32.mrf.mxu1  ;;  %v1064_v49 = vpop.f32.mrf.mxu0 }
 0x1c3   : > { %2548 = vmatmul.msk.f32.gmra.mxu0 %vm1378_vm4, %v1364_v47  ;;  %2564 = vmatmul.msk.f32.gmra.mxu1 %vm1378_vm4, %v1364_v47 }
 0x1c4   : > { %2517 = vmatmul.msk.f32.gmra.mxu2 %vm995_vm2, %v3295_v34  ;;  %2533 = vmatmul.msk.f32.gmra.mxu3 %vm995_vm2, %v2453_v46 }
 0x1c5   : > { %v1091_v2 = vpop.f32.mrf.mxu3 }
 0x1c8   : > { %v1177_v56 = vpop.f32.mrf.mxu1  ;;  %v1067_v63 = vpop.f32.mrf.mxu0 }
 0x1c9   : > { %v3386_v62 = vadd.f32 %v1177_v56, %v1064_v49 }
 0x1cb   : > { %2549 = vmatmul.msk.f32.gmra.mxu0 %vm1378_vm4, %v1365_v59  ;;  %2565 = vmatmul.msk.f32.gmra.mxu1 %vm1378_vm4, %v1365_v59 }
 0x1cc   : > { %2518 = vmatmul.msk.f32.gmra.mxu2 %vm995_vm2, %v2470_v57  ;;  %2534 = vmatmul.msk.f32.gmra.mxu3 %vm995_vm2, %v2454_v52  ;;  %v1373_v57 = vld [vmem:[%s2950_s15 + $0x78] sm:$0xff] }
 0x1d0   : > { %v1070_v4 = vpop.f32.mrf.mxu0 }
 0x1d1   : > { %v1180_v1 = vpop.f32.mrf.mxu1 }
 0x1d2   : > { %v3393_v3 = vadd.f32 %v1180_v1, %v1067_v63 }
 0x1d3   : > { %2550 = vmatmul.msk.f32.gmra.mxu0 %vm1378_vm4, %v1366_v0  ;;  %2566 = vmatmul.msk.f32.gmra.mxu1 %vm1378_vm4, %v1366_v0 }
 0x1d4   : > { %2519 = vmatmul.msk.f32.gmra.mxu2 %vm995_vm2, %v3128_v32  ;;  %2535 = vmatmul.msk.f32.gmra.mxu3 %vm995_vm2, %v3122_v29 }
 0x1d6   : > { %v1094_v8 = vpop.f32.mrf.mxu3 }
 0x1d8   : > { %v1073_v32 = vpop.f32.mrf.mxu0 }
 0x1d9   : > { %v1183_v7 = vpop.f32.mrf.mxu1 }
 0x1da   : > { %v3404_v9 = vadd.f32 %v1183_v7, %v1070_v4 }
 0x1db   : > { %2551 = vmatmul.msk.f32.gmra.mxu0 %vm1378_vm4, %v1367_v6  ;;  %2567 = vmatmul.msk.f32.gmra.mxu1 %vm1378_vm4, %v1367_v6 }
 0x1dc   : > { %2520 = vmatmul.msk.f32.gmra.mxu2 %vm995_vm2, %v3141_v37  ;;  %2536 = vmatmul.msk.f32.gmra.mxu3 %vm995_vm2, %v3197_v55 }
 0x1de   : > { %v1097_v15 = vpop.f32.mrf.mxu3 }
 0x1df   : > { %v1204_v29 = vpop.f32.mrf.mxu2 }
 0x1e0   : > { %v3412_v11 = vadd.f32 %v1204_v29, %v1091_v2 }
 0x1e1   : > { %v1186_v13 = vpop.f32.mrf.mxu1 }
 0x1e2   : > { %v3415_v14 = vadd.f32 %v1186_v13, %v1073_v32 }
 0x1e3   : > { %2552 = vmatmul.msk.f32.gmra.mxu0 %vm1378_vm4, %v1368_v12  ;;  %2568 = vmatmul.msk.f32.gmra.mxu1 %vm1378_vm4, %v1368_v12 }
 0x1e4   : > { %2521 = vmatmul.msk.f32.gmra.mxu2 %vm995_vm2, %v3175_v48  ;;  %2537 = vmatmul.msk.f32.gmra.mxu3 %vm995_vm2, %v3213_v60 }
 0x1e6   : > { %v1100_v48 = vpop.f32.mrf.mxu3 }
 0x1e7   : > { %v1207_v37 = vpop.f32.mrf.mxu2 }
 0x1e8   : > { %v3423_v55 = vadd.f32 %v1207_v37, %v1094_v8  ;;  %v1076_v16 = vpop.f32.mrf.mxu0 }
 0x1e9   : > { %v1189_v18 = vpop.f32.mrf.mxu1 }
 0x1ea   : > { %v3426_v19 = vadd.f32 %v1189_v18, %v1076_v16 }
 0x1eb   : > { %2553 = vmatmul.msk.f32.gmra.mxu0 %vm1378_vm4, %v1369_v17  ;;  %2569 = vmatmul.msk.f32.gmra.mxu1 %vm1378_vm4, %v1369_v17 }
 0x1ec   : > { %2522 = vmatmul.msk.f32.gmra.mxu2 %vm995_vm2, %v3190_v53  ;;  %2538 = vmatmul.msk.f32.gmra.mxu3 %vm995_vm2, %v3238_v10  ;;  %v1371_v10 = vld [vmem:[%s2950_s15 + $0x68] sm:$0xff] }
 0x1ef   : > { %v1210_v60 = vpop.f32.mrf.mxu2 }
 0x1f0   : > { %v3434_v20 = vadd.f32 %v1210_v60, %v1097_v15  ;;  %v1079_v21 = vpop.f32.mrf.mxu0 }
 0x1f1   : > { %v1192_v24 = vpop.f32.mrf.mxu1 }
 0x1f2   : > { %v3437_v27 = vadd.f32 %v1192_v24, %v1079_v21 }
 0x1f3   : > { %2554 = vmatmul.msk.f32.gmra.mxu0 %vm1378_vm4, %v1370_v23  ;;  %2570 = vmatmul.msk.f32.gmra.mxu1 %vm1378_vm4, %v1370_v23 }
 0x1f4   : > { %2523 = vmatmul.msk.f32.gmra.mxu2 %vm995_vm2, %v3217_v61  ;;  %2539 = vmatmul.msk.f32.gmra.mxu3 %vm995_vm2, %v3298_v35  ;;  %v1372_v35 = vld [vmem:[%s2950_s15 + $0x70] sm:$0xff] }
 0x1f6   : > { %v1103_v53 = vpop.f32.mrf.mxu3 }
 0x1f8   : > { %v1082_v36 = vpop.f32.mrf.mxu0 }
 0x1fb   : > { %2555 = vmatmul.msk.f32.gmra.mxu0 %vm1378_vm4, %v1371_v10  ;;  %2571 = vmatmul.msk.f32.gmra.mxu1 %vm1378_vm4, %v1371_v10 }
 0x1fc   : > { %2524 = vmatmul.msk.f32.gmra.mxu2 %vm995_vm2, %v3274_v22  ;;  %2540 = vmatmul.msk.f32.gmra.mxu3 %vm995_vm2, %v3309_v43 }
 0x1fe   : > { %v1106_v30 = vpop.f32.mrf.mxu3 }
 0x1ff   : > { %v1213_v34 = vpop.f32.mrf.mxu2 }
 0x200   : > { %v3452_v61 = vadd.f32 %v1213_v34, %v1100_v48  ;;  %v1195_v40 = vpop.f32.mrf.mxu1 }
 0x201   : > { %v3455_v41 = vadd.f32 %v1195_v40, %v1082_v36 }
 0x203   : > { %2556 = vmatmul.msk.f32.gmra.mxu0 %vm1378_vm4, %v1372_v35  ;;  %2572 = vmatmul.msk.f32.gmra.mxu1 %vm1378_vm4, %v1372_v35 }
 0x204   : > { %2525 = vmatmul.msk.f32.gmra.mxu2 %vm995_vm2, %v3291_v31  ;;  %2541 = vmatmul.msk.f32.gmra.mxu3 %vm995_vm2, %v3313_v45 }
 0x206   : > { %v1219_v22 = vpop.f32.mrf.mxu3 }
 0x207   : > { %v1216_v43 = vpop.f32.mrf.mxu2  ;;  %v3463_v46 = vadd.f32 %v1219_v22, %v1106_v30 }
 0x208   : > { %v3465_v50 = vadd.f32 %v1216_v43, %v1103_v53  ;;  %v1085_v51 = vpop.f32.mrf.mxu0  ;;  %v1198_v52 = vpop.f32.mrf.mxu1 }
 0x209   : > { %v3468_v58 = vadd.f32 %v1198_v52, %v1085_v51 }
 0x20b   : > { %2557 = vmatmul.msk.f32.gmra.mxu0 %vm1378_vm4, %v1373_v57  ;;  %2573 = vmatmul.msk.f32.gmra.mxu1 %vm1378_vm4, %v1373_v57 }
 0x20f   : > { %v1245_v26 = vpop.f32.mrf.mxu2  ;;  %v1310_v31 = vpop.f32.mrf.mxu3 }
 0x210   : > { %v1311_v28 = vadd.f32 %v1310_v31, %v1245_v26  ;;  %v1444_v33 = vpop.f32.mrf.mxu0  ;;  %v1529_v45 = vpop.f32.mrf.mxu1 }
 0x212   : > { %v1577_v38 = vadd.f32 %v1529_v45, %v1311_v28 }
 0x217   : > { %v1248_v42 = vpop.f32.mrf.mxu2  ;;  %v1313_v47 = vpop.f32.mrf.mxu3 }
 0x218   : > { %v1314_v49 = vadd.f32 %v1313_v47, %v1248_v42  ;;  %v1447_v56 = vpop.f32.mrf.mxu0  ;;  %v1532_v59 = vpop.f32.mrf.mxu1  ;;  %v3506_v42 = vld [vmem:[%s4352_s13] ss:$0 sm:$0xff] }
 0x219   : > { %v1493_v63 = vadd.f32 %v1447_v56, %v3386_v62 }
 0x21a   : > { %v1578_v0 = vadd.f32 %v1532_v59, %v1314_v49 }
 0x21f   : > { %v1251_v1 = vpop.f32.mrf.mxu2  ;;  %v1316_v2 = vpop.f32.mrf.mxu3 }
 0x220   : > { %v1317_v4 = vadd.f32 %v1316_v2, %v1251_v1  ;;  %v1450_v6 = vpop.f32.mrf.mxu0  ;;  %v1535_v7 = vpop.f32.mrf.mxu1 }
 0x221   : > { %v1494_v8 = vadd.f32 %v1450_v6, %v3393_v3 }
 0x222   : > { %v3474_v29 = vadd.f32 %v1535_v7, %v1317_v4  ;;  %v3516_v4 = vld [vmem:[%s4353_s14] ss:$0 sm:$0xff] }
 0x227   : > { %v1254_v32 = vpop.f32.mrf.mxu2  ;;  %v1319_v12 = vpop.f32.mrf.mxu3 }
 0x228   : > { %v1320_v13 = vadd.f32 %v1319_v12, %v1254_v32  ;;  %v1453_v15 = vpop.f32.mrf.mxu0  ;;  %v1538_v37 = vpop.f32.mrf.mxu1  ;;  %v1638_v32 = vmul.f32 %v3506_v42, %v1578_v0  ;;  %v1639_v0 = vmul.f32 %v3506_v42, %v3474_v29 }
 0x229   : > { %v1495_v16 = vadd.f32 %v1453_v15, %v3404_v9  ;;  %v1175_v9 = vadd.f32 %v3375_v44, %v3366_v39  ;;  %v3499_v39 = vld [vmem:[%s4351_s12] ss:$0 sm:$0xff] }
 0x22a   : > { %v3477_v17 = vadd.f32 %v1538_v37, %v1320_v13 }
 0x22b   : > { %v1492_v43 = vadd.f32 %v1444_v33, %v1175_v9 }
 0x22f   : > { %v1257_v62 = vpop.f32.mrf.mxu2  ;;  %v1322_v18 = vpop.f32.mrf.mxu3 }
 0x230   : > { %v1323_v48 = vadd.f32 %v1322_v18, %v1257_v62  ;;  %v1456_v60 = vpop.f32.mrf.mxu0  ;;  %v1541_v21 = vpop.f32.mrf.mxu1 }
 0x231   : > { %v1496_v23 = vadd.f32 %v1456_v60, %v3415_v14  ;;  %v3490_v14 = vld [vmem:[%s4350_s11] ss:$0 sm:$0xff] }
 0x232   : > { %v3480_v24 = vadd.f32 %v1541_v21, %v1323_v48  ;;  %v1598_v44 = vmul.f32 %v3490_v14, %v1493_v63  ;;  %v1637_v63 = vmul.f32 %v3506_v42, %v1577_v38  ;;  %v1599_v6 = vmul.f32 %v3490_v14, %v1494_v8 }
 0x233   : > { %v1600_v7 = vmul.f32 %v3490_v14, %v1495_v16  ;;  %v3528_v16 = vadd.f32 %v3516_v4, %v1638_v32  ;;  %v1601_v21 = vmul.f32 %v3490_v14, %v1496_v23 }
 0x234   : > { %v1618_v1 = vadd.f32 %v3499_v39, %v1598_v44  ;;  %v3522_v15 = vadd.f32 %v3516_v4, %v1637_v63  ;;  %v1619_v38 = vadd.f32 %v3499_v39, %v1599_v6 }
 0x235   : > { %v1620_v48 = vadd.f32 %v3499_v39, %v1600_v7  ;;  %4417 = vst [vmem:[#allocation12_spill] sm:$0xff] %v3528_v16  ;;  %v1621_v9 = vadd.f32 %v3499_v39, %v1601_v21 }
 0x236   : > { %v2575_v12 = vmul.f32 -1.442695, %v1618_v1  ;;  %4416 = vst [vmem:[#allocation11_spill] sm:$0xff] %v3522_v15 }
 0x237   : > { %v1260_v3 = vpop.f32.mrf.mxu2  ;;  %v1325_v53 = vpop.f32.mrf.mxu3 }
 0x238   : > { %v1326_v10 = vadd.f32 %v1325_v53, %v1260_v3  ;;  %v1459_v30 = vpop.f32.mrf.mxu0  ;;  %v1544_v34 = vpop.f32.mrf.mxu1  ;;  %v1993_v3 = vmin.f32 %v3522_v15, 20.0  ;;  %v2576_v53 = vmul.f32 -1.442695, %v1619_v38 }
 0x239   : > { %v1497_v36 = vadd.f32 %v1459_v30, %v3426_v19  ;;  %v1597_v19 = vmul.f32 %v3490_v14, %v1492_v43 }
 0x23a   : > { %v3483_v40 = vadd.f32 %v1544_v34, %v1326_v10  ;;  %v2577_v10 = vmul.f32 -1.442695, %v1620_v48  ;;  %v1994_v34 = vmin.f32 %v3528_v16, 20.0 }
 0x23b   : > { %v1617_v45 = vadd.f32 %v3499_v39, %v1597_v19  ;;  %v1602_v43 = vmul.f32 %v3490_v14, %v1497_v36 }
 0x23c   : > { %v2011_v19 = vmul.f32 1.442695, %v1994_v34 }
 0x23d   : > { %v2574_v2 = vmul.f32 -1.442695, %v1617_v45  ;;  %v1622_v36 = vadd.f32 %v3499_v39, %v1602_v43 }
 0x23f   : > { %v1263_v35 = vpop.f32.mrf.mxu2  ;;  %v1328_v22 = vpop.f32.mrf.mxu3  ;;  %2639 = vpow2.f32 %v2574_v2  ;;  %v1202_v2 = vadd.f32 %v3401_v5, %v3383_v54 }
 0x240   : > { %v1329_v51 = vadd.f32 %v1328_v22, %v1263_v35  ;;  %v1462_v52 = vpop.f32.mrf.mxu0  ;;  %v1547_v57 = vpop.f32.mrf.mxu1  ;;  %2641 = vpow2.f32 %v2575_v12  ;;  %v2009_v22 = vmul.f32 1.442695, %v1993_v3 }
 0x241   : > { %v1498_v26 = vadd.f32 %v1462_v52, %v3437_v27  ;;  %2643 = vpow2.f32 %v2576_v53 }
 0x242   : > { %v3493_v31 = vadd.f32 %v1547_v57, %v1329_v51  ;;  %2645 = vpow2.f32 %v2577_v10 }
 0x243   : > { %v1603_v45 = vmul.f32 %v3490_v14, %v1498_v26  ;;  %2647 = vpow2.f32 %v2009_v22 }
 0x244   : > { %v1643_v10 = vmul.f32 %v3506_v42, %v3493_v31 }
 0x245   : > { %v2640_v30 = vpop.eup %2639  ;;  %v1623_v6 = vadd.f32 %v3499_v39, %v1603_v45 }
 0x246   : > { %v2642_v52 = vpop.eup %2641  ;;  %v3546_v57 = vadd.f32 1.0, %v2640_v30 }
 0x247   : > { %v1266_v28 = vpop.f32.mrf.mxu2  ;;  %v1331_v33 = vpop.f32.mrf.mxu3  ;;  %v2580_v53 = vmul.f32 -1.442695, %v1623_v6 }
 0x248   : > { %v1332_v27 = vadd.f32 %v1331_v33, %v1266_v28  ;;  %v1465_v47 = vpop.f32.mrf.mxu0  ;;  %v1550_v49 = vpop.f32.mrf.mxu1  ;;  %4419 = vst [vmem:[#allocation14_spill] sm:$0xff] %v3546_v57  ;;  %v2578_v28 = vmul.f32 -1.442695, %v1621_v9  ;;  %v1641_v33 = vmul.f32 %v3506_v42, %v3480_v24  ;;  %2649 = vrcp.f32 %v3546_v57 }
 0x249   : > { %v1499_v56 = vadd.f32 %v1465_v47, %v3455_v41  ;;  %v1642_v47 = vmul.f32 %v3506_v42, %v3483_v40  ;;  %v2644_v1 = vpop.eup %2643  ;;  %2651 = vpow2.f32 %v2011_v19  ;;  %v2579_v40 = vmul.f32 -1.442695, %v1622_v36 }
 0x24a   : > { %v3509_v59 = vadd.f32 %v1550_v49, %v1332_v27  ;;  %v3552_v27 = vadd.f32 1.0, %v2642_v52  ;;  %v2646_v63 = vpop.eup %2645  ;;  %2653 = vpow2.f32 %v2578_v28  ;;  %v3562_v26 = vadd.f32 %v3516_v4, %v1641_v33 }
 0x24b   : > { %v1604_v49 = vmul.f32 %v3490_v14, %v1499_v56  ;;  %v3566_v38 = vadd.f32 1.0, %v2644_v1  ;;  %v3569_v54 = vadd.f32 %v3516_v4, %v1642_v47  ;;  %v3601_v33 = vadd.f32 %v3516_v4, %v1643_v10 }
 0x24c   : > { %4420 = vst [vmem:[#allocation15_spill] sm:$0xff] %v3552_v27  ;;  %2655 = vrcp.f32 %v3552_v27  ;;  %v1997_v3 = vmin.f32 %v3562_v26, 20.0 }
 0x24d   : > { %4421 = vst [vmem:[#allocation16_spill] sm:$0xff] %v3562_v26  ;;  %v1624_v5 = vadd.f32 %v3499_v39, %v1604_v49 }
 0x24e   : > { %4422 = vst [vmem:[#allocation17_spill] sm:$0xff] %v3566_v38  ;;  %v2017_v28 = vmul.f32 1.442695, %v1997_v3 }
 0x24f   : > { %v1269_v41 = vpop.f32.mrf.mxu2  ;;  %v1334_v13 = vpop.f32.mrf.mxu3  ;;  %4423 = vst [vmem:[#allocation18_spill] sm:$0xff] %v3569_v54  ;;  %v2581_v43 = vmul.f32 -1.442695, %v1624_v5 }
 0x250   : > { %v1335_v37 = vadd.f32 %v1334_v13, %v1269_v41  ;;  %v1468_v62 = vpop.f32.mrf.mxu0  ;;  %v1553_v18 = vpop.f32.mrf.mxu1  ;;  %4429 = vst [vmem:[#allocation24_spill] sm:$0xff] %v3601_v33 }
 0x251   : > { %v1500_v8 = vadd.f32 %v1468_v62, %v3468_v58  ;;  %v3538_v58 = vadd.f32 %v3516_v4, %v1639_v0  ;;  %v3573_v62 = vpop.eup %2647 }
 0x252   : > { %v3532_v60 = vadd.f32 %v1553_v18, %v1335_v37  ;;  %4424 = vst [vmem:[#allocation19_spill] sm:$0xff] %v3573_v62  ;;  %v3575_v18 = vadd.f32 1.0, %v2646_v63  ;;  %v3578_v21 = vpop.eup %2649 }
 0x253   : > { %4418 = vst [vmem:[#allocation13_spill] sm:$0xff] %v3538_v58  ;;  %v1995_v44 = vmin.f32 %v3538_v58, 20.0  ;;  %v1605_v48 = vmul.f32 %v3490_v14, %v1500_v8  ;;  %v3584_v34 = vpop.eup %2651  ;;  %v1998_v8 = vmin.f32 %v3569_v54, 20.0 }
 0x254   : > { %4425 = vst [vmem:[#allocation20_spill] sm:$0xff] %v3575_v18  ;;  %v2654_v22 = vpop.eup %2653  ;;  %v1645_v1 = vmul.f32 %v3506_v42, %v3532_v60 }
 0x255   : > { %v2013_v24 = vmul.f32 1.442695, %v1995_v44  ;;  %4426 = vst [vmem:[#allocation21_spill] sm:$0xff] %v3578_v21  ;;  %v3592_v52 = vpop.eup %2655  ;;  %v1625_v31 = vadd.f32 %v3499_v39, %v1605_v48  ;;  %v3606_v49 = vadd.f32 1.0, %v2654_v22  ;;  %v2019_v63 = vmul.f32 1.442695, %v1998_v8 }
 0x256   : > { %4427 = vst [vmem:[#allocation22_spill] sm:$0xff] %v3584_v34 }
 0x257   : > { %v3541_v35 = vpop.f32.mrf.mxu2  ;;  %v1337_v29 = vpop.f32.mrf.mxu3  ;;  %2657 = vpow2.f32 %v2013_v24  ;;  %4428 = vst [vmem:[#allocation23_spill] sm:$0xff] %v3592_v52 }
 0x258   : > { %v1471_v23 = vpop.f32.mrf.mxu0  ;;  %v3544_v51 = vpop.f32.mrf.mxu1  ;;  %2659 = vpow2.f32 %v2579_v40  ;;  %v1338_v19 = vadd.f32 %v1337_v29, %v3541_v35  ;;  %4431 = vst [vmem:[#allocation26_spill] sm:$0xff] %v3606_v49  ;;  %v2582_v40 = vmul.f32 -1.442695, %v1625_v31 }
 0x259   : > { %v1501_v12 = vadd.f32 %v1471_v23, %v1202_v2  ;;  %2661 = vrcp.f32 %v3566_v38  ;;  %v1644_v23 = vmul.f32 %v3506_v42, %v3509_v59 }
 0x25a   : > { %2663 = vrcp.f32 %v3575_v18 }
 0x25b   : > { %2665 = vpow2.f32 %v2580_v53  ;;  %v3612_v6 = vadd.f32 %v3516_v4, %v1644_v23 }
 0x25c   : > { %2667 = vpow2.f32 %v2581_v43 }
 0x25d   : > { %v3604_v47 = vpop.eup %2657  ;;  %4432 = vst [vmem:[#allocation27_spill] sm:$0xff] %v3612_v6  ;;  %2669 = vpow2.f32 %v2017_v28  ;;  %v2000_v10 = vmin.f32 %v3612_v6, 20.0 }
 0x25e   : > { %4430 = vst [vmem:[#allocation25_spill] sm:$0xff] %v3604_v47  ;;  %2671 = vrcp.f32 %v3606_v49 }
 0x25f   : > { %v1275_v7 = vpop.f32.mrf.mxu2  ;;  %v1340_v32 = vpop.f32.mrf.mxu3  ;;  %2673 = vpow2.f32 %v2019_v63 }
 0x260   : > { %v1341_v56 = vadd.f32 %v1340_v32, %v1275_v7  ;;  %v1474_v41 = vpop.f32.mrf.mxu0  ;;  %v1559_v13 = vpop.f32.mrf.mxu1  ;;  %2675 = vpow2.f32 %v2582_v40 }
 0x261   : > { %v1502_v37 = vadd.f32 %v1474_v41, %v3412_v11  ;;  %v1606_v11 = vmul.f32 %v3490_v14, %v1501_v12  ;;  %v2660_v32 = vpop.eup %2659  ;;  %v1586_v12 = vadd.f32 %v3544_v51, %v1338_v19 }
 0x262   : > { %v1587_v0 = vadd.f32 %v1559_v13, %v1341_v56  ;;  %v3617_v60 = vpop.eup %2661  ;;  %v1999_v13 = vmin.f32 %v3601_v33, 20.0  ;;  %v3628_v53 = vadd.f32 1.0, %v2660_v32 }
 0x263   : > { %v1607_v30 = vmul.f32 %v3490_v14, %v1502_v37  ;;  %v1626_v35 = vadd.f32 %v3499_v39, %v1606_v11  ;;  %4433 = vst [vmem:[#allocation28_spill] sm:$0xff] %v3617_v60  ;;  %v3621_v48 = vpop.eup %2663  ;;  %v1646_v11 = vmul.f32 %v3506_v42, %v1586_v12 }
 0x264   : > { %v1647_v9 = vmul.f32 %v3506_v42, %v1587_v0  ;;  %4434 = vst [vmem:[#allocation29_spill] sm:$0xff] %v3621_v48  ;;  %v2666_v3 = vpop.eup %2665  ;;  %v2021_v43 = vmul.f32 1.442695, %v1999_v13 }
 0x265   : > { %v1627_v45 = vadd.f32 %v3499_v39, %v1607_v30  ;;  %v2583_v0 = vmul.f32 -1.442695, %v1626_v35  ;;  %4436 = vst [vmem:[#allocation31_spill] sm:$0xff] %v3628_v53  ;;  %v2668_v8 = vpop.eup %2667  ;;  %v3636_v19 = vadd.f32 1.0, %v2666_v3  ;;  %v2023_v35 = vmul.f32 1.442695, %v2000_v10 }
 0x266   : > { %v3598_v44 = vadd.f32 %v3516_v4, %v1647_v9  ;;  %v3646_v63 = vadd.f32 %v3516_v4, %v1646_v11  ;;  %v3651_v12 = vadd.f32 1.0, %v2668_v8 }
 0x267   : > { %v1278_v36 = vpop.f32.mrf.mxu2  ;;  %v1343_v59 = vpop.f32.mrf.mxu3  ;;  %v2584_v5 = vmul.f32 -1.442695, %v1627_v45  ;;  %4437 = vst [vmem:[#allocation32_spill] sm:$0xff] %v3636_v19 }
 0x268   : > { %v1344_v29 = vadd.f32 %v1343_v59, %v1278_v36  ;;  %v1477_v2 = vpop.f32.mrf.mxu0  ;;  %v1562_v24 = vpop.f32.mrf.mxu1  ;;  %v2003_v56 = vmin.f32 %v3598_v44, 20.0  ;;  %4441 = vst [vmem:[#allocation36_spill] sm:$0xff] %v3651_v12  ;;  %v2002_v3 = vmin.f32 %v3646_v63, 20.0 }
 0x269   : > { %v1503_v7 = vadd.f32 %v1477_v2, %v3423_v55  ;;  %v3625_v55 = vadd.f32 %v3516_v4, %v1645_v1  ;;  %2677 = vpow2.f32 %v2584_v5  ;;  %v3639_v1 = vpop.eup %2669 }
 0x26a   : > { %v1588_v41 = vadd.f32 %v1562_v24, %v1344_v29  ;;  %v2029_v9 = vmul.f32 1.442695, %v2003_v56  ;;  %2679 = vpow2.f32 %v2583_v0  ;;  %4438 = vst [vmem:[#allocation33_spill] sm:$0xff] %v3639_v1  ;;  %v3643_v24 = vpop.eup %2671 }
 0x26b   : > { %v1608_v37 = vmul.f32 %v3490_v14, %v1503_v7  ;;  %4435 = vst [vmem:[#allocation30_spill] sm:$0xff] %v3625_v55  ;;  %v2001_v28 = vmin.f32 %v3625_v55, 20.0  ;;  %2681 = vrcp.f32 %v3628_v53  ;;  %v3649_v40 = vpop.eup %2673 }
 0x26c   : > { %v1648_v51 = vmul.f32 %v3506_v42, %v1588_v41  ;;  %4439 = vst [vmem:[#allocation34_spill] sm:$0xff] %v3643_v24  ;;  %2683 = vpow2.f32 %v2029_v9  ;;  %v2676_v41 = vpop.eup %2675 }
 0x26d   : > { %v1628_v30 = vadd.f32 %v3499_v39, %v1608_v37  ;;  %4440 = vst [vmem:[#allocation35_spill] sm:$0xff] %v3649_v40  ;;  %2685 = vpow2.f32 %v2021_v43  ;;  %v1640_v37 = vmul.f32 %v3506_v42, %v3477_v17  ;;  %v3666_v9 = vadd.f32 1.0, %v2676_v41 }
 0x26e   : > { %v3634_v22 = vadd.f32 %v3516_v4, %v1648_v51  ;;  %2687 = vrcp.f32 %v3636_v19 }
 0x26f   : > { %v1281_v23 = vpop.f32.mrf.mxu2  ;;  %v1346_v31 = vpop.f32.mrf.mxu3  ;;  %v2585_v29 = vmul.f32 -1.442695, %v1628_v30 }
 0x270   : > { %v1347_v45 = vadd.f32 %v1346_v31, %v1281_v23  ;;  %v1480_v36 = vpop.f32.mrf.mxu0  ;;  %v1565_v59 = vpop.f32.mrf.mxu1  ;;  %v2004_v7 = vmin.f32 %v3634_v22, 20.0  ;;  %vm1988_vm10 = vcmp.gt.f32.partialorder %v3634_v22, 20.0 }
 0x271   : > { %v1504_v2 = vadd.f32 %v1480_v36, %v3434_v20  ;;  %v2025_v20 = vmul.f32 1.442695, %v2001_v28  ;;  %v2678_v5 = vpop.eup %2677  ;;  %2689 = vpow2.f32 %v2585_v29  ;;  %v3676_v29 = vadd.f32 %v3516_v4, %v1640_v37 }
 0x272   : > { %v1589_v32 = vadd.f32 %v1565_v59, %v1347_v45  ;;  %v2680_v51 = vpop.eup %2679  ;;  %2691 = vpow2.f32 %v2023_v35  ;;  %v2031_v10 = vmul.f32 1.442695, %v2004_v7  ;;  %v3670_v31 = vadd.f32 1.0, %v2678_v5 }
 0x273   : > { %v1609_v56 = vmul.f32 %v3490_v14, %v1504_v2  ;;  %v3663_v11 = vpop.eup %2681  ;;  %2693 = vrcp.f32 %v3651_v12  ;;  %4444 = vst [vmem:[#allocation39_spill] sm:$0xff] %v3676_v29  ;;  %v3678_v2 = vadd.f32 1.0, %v2680_v51 }
 0x274   : > { %v1649_v13 = vmul.f32 %v3506_v42, %v1589_v32  ;;  %4442 = vst [vmem:[#allocation37_spill] sm:$0xff] %v3663_v11  ;;  %v3668_v23 = vpop.eup %2683  ;;  %2695 = vpow2.f32 %v2025_v20  ;;  %v1898_v62 = vand.u32 2147483648, %v3670_v31 }
 0x275   : > { %v1629_v0 = vadd.f32 %v3499_v39, %v1609_v56  ;;  %v3673_v35 = vpop.eup %2685  ;;  %v2027_v56 = vmul.f32 1.442695, %v2002_v3  ;;  %v2131_v5 = vadd.f32 1.0, %v3668_v23  ;;  %v1996_v3 = vmin.f32 %v3676_v29, 20.0 }
 0x276   : > { %v3661_v30 = vadd.f32 %v3516_v4, %v1649_v13  ;;  %4443 = vst [vmem:[#allocation38_spill] sm:$0xff] %v3673_v35  ;;  %v3681_v32 = vpop.eup %2687 }
 0x277   : > { %v2586_v8 = vmul.f32 -1.442695, %v1629_v0  ;;  %v1284_v43 = vpop.f32.mrf.mxu2  ;;  %v1349_v17 = vpop.f32.mrf.mxu3  ;;  %4445 = vst [vmem:[#allocation40_spill] sm:$0xff] %v3681_v32 }
 0x278   : > { %v2005_v28 = vmin.f32 %v3661_v30, 20.0  ;;  %v1350_v45 = vadd.f32 %v1349_v17, %v1284_v43  ;;  %v1483_v36 = vpop.f32.mrf.mxu0  ;;  %v1568_v59 = vpop.f32.mrf.mxu1 }
 0x279   : > { %2697 = vpow2.f32 %v2586_v8  ;;  %v1505_v7 = vadd.f32 %v1483_v36, %v3452_v61  ;;  %v2690_v20 = vpop.eup %2689 }
 0x27a   : > { %2699 = vpow2.f32 %v2031_v10  ;;  %v1590_v41 = vadd.f32 %v1568_v59, %v1350_v45  ;;  %v3686_v0 = vpop.eup %2691  ;;  %v2033_v37 = vmul.f32 1.442695, %v2005_v28  ;;  %v3697_v43 = vadd.f32 1.0, %v2690_v20 }
 0x27b   : > { %2701 = vrcp.f32 %v3666_v9  ;;  %v1610_v13 = vmul.f32 %v3490_v14, %v1505_v7  ;;  %4446 = vst [vmem:[#allocation41_spill] sm:$0xff] %v3686_v0  ;;  %v3690_v61 = vpop.eup %2693  ;;  %v2134_v28 = vmul.f32 -0.5, %v3668_v23 }
 0x27c   : > { %2703 = vrcp.f32 %v3670_v31  ;;  %v1650_v51 = vmul.f32 %v3506_v42, %v1590_v41  ;;  %4447 = vst [vmem:[#allocation42_spill] sm:$0xff] %v3690_v61  ;;  %v3695_v8 = vpop.eup %2695 }
 0x27d   : > { %2705 = vrcp.f32 %v3678_v2  ;;  %v1630_v10 = vadd.f32 %v3499_v39, %v1610_v13  ;;  %v2135_v58 = vadd.f32 1.0, %v2134_v28 }
 0x27e   : > { %2707 = vpow2.f32 %v2027_v56  ;;  %v3700_v17 = vadd.f32 %v3516_v4, %v1650_v51  ;;  %v3710_v51 = vmul.f32 1.442695, %v1996_v3  ;;  %v1913_v3 = vand.u32 2147483648, %v3697_v43 }
 0x27f   : > { %v2698_v45 = vpop.eup %2697  ;;  %v2587_v36 = vmul.f32 -1.442695, %v1630_v10  ;;  %v1287_v59 = vpop.f32.mrf.mxu2  ;;  %2709 = vlog2.f32 %v2131_v5 }
 0x280   : > { %v1352_v7 = vpop.f32.mrf.mxu3  ;;  %v3703_v41 = vpop.eup %2699  ;;  %v3705_v25 = vadd.f32 1.0, %v2698_v45  ;;  %2711 = vpow2.f32 %v2033_v37  ;;  %v2006_v13 = vmin.f32 %v3700_v17, 20.0  ;;  %4448 = vst [vmem:[#allocation43_spill] sm:$0xff] %v3710_v51  ;;  %v3749_v29 = vor.u32 1.1754944e-38, %v1913_v3 }
 0x281   : > { %v1353_v56 = vadd.f32 %v1352_v7, %v1287_v59  ;;  %v1486_v20 = vpop.f32.mrf.mxu0  ;;  %v1571_v15 = vpop.f32.mrf.mxu1  ;;  %2713 = vpow2.f32 %v2587_v36  ;;  %v2140_v36 = vadd.f32 1.0, %v3703_v41  ;;  %vm1990_vm9 = vcmp.gt.f32.partialorder %v3700_v17, 20.0 }
 0x282   : > { %v3708_v16 = vpop.eup %2701  ;;  %v1506_v10 = vadd.f32 %v1486_v20, %v3465_v50  ;;  %2715 = vrcp.f32 %v3697_v43  ;;  %v2035_v45 = vmul.f32 1.442695, %v2006_v13  ;;  %v2143_v20 = vmul.f32 -0.5, %v3703_v41 }
 0x283   : > { %v3714_v5 = vpop.eup %2703  ;;  %v1591_v37 = vadd.f32 %v1571_v15, %v1353_v56  ;;  %2717 = vrcp.f32 %v3705_v25  ;;  %v3743_v15 = vmul.f32 %v3668_v23, %v2135_v58  ;;  %v1928_v3 = vand.u32 2147483648, %v3705_v25 }
 0x284   : > { %v3717_v21 = vpop.eup %2705  ;;  %v1611_v59 = vmul.f32 %v3490_v14, %v1506_v10  ;;  %2719 = vpow2.f32 %v2035_v45  ;;  %v3731_v56 = vmul.f32 %v3714_v5, %v3670_v31  ;;  %v3733_v10 = vor.u32 1.1754944e-38, %v1898_v62 }
 0x285   : > { %v3723_v50 = vpop.eup %2707  ;;  %v1651_v7 = vmul.f32 %v3506_v42, %v1591_v37  ;;  %2721 = vlog2.f32 %v2140_v36  ;;  %v2144_v54 = vadd.f32 1.0, %v2143_v20  ;;  %v3784_v24 = vor.u32 1.1754944e-38, %v1928_v3 }
 0x286   : > { %v2710_v28 = vpop.eup %2709  ;;  %v1631_v13 = vadd.f32 %v3499_v39, %v1611_v59  ;;  %v3747_v59 = vmul.f32 %v3717_v21, %v3678_v2  ;;  %v1889_v36 = vsub.f32 1.0, %v3731_v56  ;;  %vm1922_vm2 = vweird.f32 %v3705_v25 }
 0x287   : > { %v3736_v34 = vpop.eup %2711  ;;  %v3739_v45 = vadd.f32 %v3516_v4, %v1651_v7  ;;  %v1290_v62 = vpop.f32.mrf.mxu2 }
 0x288   : > { %v2714_v52 = vpop.eup %2713  ;;  %v2588_v27 = vmul.f32 -1.442695, %v1631_v13  ;;  %v1355_v47 = vpop.f32.mrf.mxu3 }
 0x289   : > { %v3752_v7 = vpop.eup %2715  ;;  %v3754_v26 = vadd.f32 1.0, %v2714_v52  ;;  %v2007_v58 = vmin.f32 %v3739_v45, 20.0  ;;  %v1356_v37 = vadd.f32 %v1355_v47, %v1290_v62  ;;  %v1489_v60 = vpop.f32.mrf.mxu0  ;;  %v2149_v47 = vadd.f32 1.0, %v3736_v34 }
 0x28a   : > { %v1574_v38 = vpop.f32.mrf.mxu1  ;;  %v3757_v48 = vpop.eup %2717  ;;  %2723 = vpow2.f32 %v2588_v27  ;;  %v1507_v13 = vadd.f32 %v1489_v60, %v3463_v46  ;;  %v2152_v27 = vmul.f32 -0.5, %v3736_v34  ;;  %v3771_v46 = vmul.f32 %v3752_v7, %v3697_v43 }
 0x28b   : > { %v3762_v57 = vpop.eup %2719  ;;  %2725 = vrcp.f32 %v3754_v26  ;;  %v2037_v52 = vmul.f32 1.442695, %v2007_v58  ;;  %v1592_v18 = vadd.f32 %v1574_v38, %v1356_v37  ;;  %v1918_v56 = vmul.f32 %v3757_v48, %v3705_v25 }
 0x28c   : > { %v1612_v62 = vmul.f32 %v3490_v14, %v1507_v13  ;;  %v2158_v20 = vadd.f32 1.0, %v3762_v57  ;;  %v3776_v58 = vmul.f32 0.6931472, %v2710_v28  ;;  %v2722_v38 = vpop.eup %2721  ;;  %v1926_v14 = vand.u32 2147483647, %v3705_v25 }
 0x28d   : > { %2727 = vpow2.f32 %v2037_v52  ;;  %v1652_v60 = vmul.f32 %v3506_v42, %v1592_v18  ;;  %v2155_v42 = vand.u32 2147483647, %v3736_v34  ;;  %v2161_v28 = vmul.f32 -0.5, %v3762_v57 }
 0x28e   : > { %v1632_v37 = vadd.f32 %v3499_v39, %v1612_v62  ;;  %2729 = vlog2.f32 %v2158_v20  ;;  %v2153_v49 = vadd.f32 1.0, %v2152_v27  ;;  %v1904_v39 = vsub.f32 1.0, %v3771_v46 }
 0x28f   : > { %v3782_v1 = vadd.f32 %v3516_v4, %v1652_v60  ;;  %2731 = vlog2.f32 %v2149_v47  ;;  %v1919_v4 = vsub.f32 1.0, %v1918_v56  ;;  %v3794_v60 = vmul.f32 0.6931472, %v2722_v38 }
 0x290   : > { %v2724_v18 = vpop.eup %2723  ;;  %v2589_v52 = vmul.f32 -1.442695, %v1632_v37  ;;  %v1943_v47 = vand.u32 2147483648, %v3754_v26  ;;  %v3800_v37 = vmul.f32 %v3703_v41, %v2144_v54  ;;  %v3808_v56 = vmul.f32 %v3714_v5, %v1889_v36 }
 0x291   : > { %v3789_v62 = vpop.eup %2725  ;;  %v3791_v20 = vadd.f32 1.0, %v2724_v18  ;;  %v2008_v13 = vmin.f32 %v3782_v1, 20.0  ;;  %v2164_v18 = vand.u32 2147483647, %v3762_v57  ;;  %v1941_v33 = vand.u32 2147483647, %v3754_v26 }
 0x292   : > { %2733 = vpow2.f32 %v2589_v52  ;;  %v1933_v3 = vmul.f32 %v3789_v62, %v3754_v26  ;;  %v2162_v40 = vadd.f32 1.0, %v2161_v28  ;;  %vm1923_vm5 = vweird.f32 %v3757_v48 }
 0x293   : > { %v3802_v27 = vpop.eup %2727  ;;  %2735 = vrcp.f32 %v3791_v20  ;;  %v2039_v46 = vmul.f32 1.442695, %v2008_v13  ;;  %vm3813_vm6 = vcmp.lt.f32.partialorder %v2155_v42, 0.0004427343  ;;  %vm1908_vm7 = vweird.f32 %v3752_v7  ;;  %vm3883_vm3 = vmor %vm1922_vm2, %vm1923_vm5 }
 0x294   : > { %v2730_v38 = vpop.eup %2729  ;;  %v2167_v52 = vadd.f32 1.0, %v3802_v27  ;;  %v2170_v51 = vmul.f32 -0.5, %v3802_v27  ;;  %v1934_v36 = vsub.f32 1.0, %v1933_v3  ;;  %v1920_v11 = vmul.f32 %v3757_v48, %v1919_v4 }
 0x295   : > { %v2732_v13 = vpop.eup %2731  ;;  %2737 = vpow2.f32 %v2039_v46  ;;  %v1958_v53 = vand.u32 2147483648, %v3791_v20  ;;  %vm1937_vm8 = vweird.f32 %v3754_v26  ;;  %v3822_v28 = vor.u32 1.1754944e-38, %v1943_v47 }
 0x296   : > { %2739 = vlog2.f32 %v2167_v52  ;;  %v2173_v42 = vand.u32 2147483647, %v3802_v27  ;;  %v1935_v46 = vmul.f32 %v3789_v62, %v1934_v36  ;;  %v2160_v35 = vmul.f32 0.6931472, %v2730_v38 }
 0x297   : > { %vm3828_vm11 = vcmp.lt.f32.partialorder %v2164_v18, 0.0004427343  ;;  %vm3832_vm12 = vcmp.eq.f32.partialorder %v1926_v14, 8.507059e+37  ;;  %v2163_v52 = vmul.f32 %v3762_v57, %v2162_v40  ;;  %v2151_v6 = vmul.f32 0.6931472, %v2732_v13 }
 0x298   : > { %v2734_v47 = vpop.eup %2733  ;;  %v2154_v32 = vmul.f32 %v3736_v34, %v2153_v49  ;;  %v1905_v38 = vmul.f32 %v3752_v7, %v1904_v39  ;;  %v4455_v18 = vand.u32 2147483647, %v3703_v41  ;;  %v2171_v55 = vadd.f32 1.0, %v2170_v51 }
 0x299   : > { %v3847_v14 = vpop.eup %2735  ;;  %v3849_v19 = vadd.f32 1.0, %v2734_v47  ;;  %vm1938_vm0 = vweird.f32 %v3789_v62  ;;  %vm3852_vm1 = vcmp.eq.f32.partialorder %v1941_v33, 8.507059e+37  ;;  %v1921_v34 = vadd.f32 %v3757_v48, %v1920_v11 }
 0x29a   : > { %vm3843_vm15 = vcmp.lt.f32.partialorder %v4455_v18, 0.0004427343  ;;  %v1948_v49 = vmul.f32 %v3847_v14, %v3791_v20  ;;  %v1956_v40 = vand.u32 2147483647, %v3791_v20  ;;  %v3862_v41 = vor.u32 1.1754944e-38, %v1958_v53 }
 0x29b   : > { %v4460_v51 = vand.u32 2147483647, %v3697_v43  ;;  %v2738_v39 = vpop.eup %2737  ;;  %2741 = vrcp.f32 %v3849_v19  ;;  %vm3871_vm14 = vcmp.lt.f32.partialorder %v2173_v42, 0.0004427343  ;;  %v1936_v13 = vadd.f32 %v3789_v62, %v1935_v46 }
 0x29c   : > { %v2166_v47 = vsel %vm3828_vm11, %v2163_v52, %v2160_v35  ;;  %v2740_v53 = vpop.eup %2739  ;;  %v2176_v18 = vadd.f32 1.0, %v2738_v39  ;;  %v2179_v0 = vmul.f32 -0.5, %v2738_v39  ;;  %v1949_v61 = vsub.f32 1.0, %v1948_v49 }
 0x29d   : > { %vm3866_vm13 = vcmp.eq.f32.partialorder %v4460_v51, 8.507059e+37  ;;  %vm1991_vm4 = vcmp.gt.f32.partialorder %v3739_v45, 20.0  ;;  %v1906_v51 = vadd.f32 %v3752_v7, %v1905_v38  ;;  %v1971_v35 = vand.u32 2147483647, %v3849_v19 }
 0x29e   : > { %v2172_v46 = vmul.f32 %v3802_v27, %v2171_v55  ;;  %v1925_v3 = vsel %vm3883_vm3, %v3757_v48, %v1921_v34  ;;  %v2157_v52 = vsel %vm3813_vm6, %v2154_v32, %v2151_v6  ;;  %v4467_v25 = vand.u32 2147483647, %v3668_v23  ;;  %vm3912_vm6 = vmor %vm1937_vm8, %vm1938_vm0  ;;  %v4515_v55 = vld [vmem:[#allocation38_spill] sm:$0xff] }
 0x29f   : > { %v1973_v38 = vand.u32 2147483648, %v3849_v19  ;;  %2743 = vlog2.f32 %v2176_v18  ;;  %v1950_v12 = vmul.f32 %v3847_v14, %v1949_v61  ;;  %vm3904_vm5 = vcmp.eq.f32.partialorder %v1956_v40, 8.507059e+37 }
 0x2a0   : > { %vm3898_vm2 = vcmp.lt.f32.partialorder %v4467_v25, 0.0004427343  ;;  %v2169_v27 = vmul.f32 0.6931472, %v2740_v53  ;;  %v4474_v48 = vand.u32 2147483647, %v3670_v31  ;;  %vm1953_vm3 = vweird.f32 %v3847_v14 }
 0x2a1   : > { %v2182_v32 = vand.u32 2147483647, %v2738_v39  ;;  %v1940_v61 = vsel %vm3912_vm6, %v3789_v62, %v1936_v13  ;;  %v2198_v26 = vsel %vm1990_vm9, %v3700_v17, %v2166_v47  ;;  %vm4477_vm8 = vweird.f32 %v3697_v43  ;;  %v2742_v17 = vpop.eup %2741 }
 0x2a2   : > { %vm3918_vm11 = vcmp.eq.f32.partialorder %v4474_v48, 8.507059e+37  ;;  %vm3933_vm0 = vmor %vm4477_vm8, %vm1908_vm7  ;;  %v2180_v34 = vadd.f32 1.0, %v2179_v0  ;;  %v1951_v40 = vadd.f32 %v3847_v14, %v1950_v12  ;;  %v1930_v53 = vsel %vm3832_vm12, %v3784_v24, %v1925_v3 }
 0x2a3   : > { %v1910_v62 = vsel %vm3933_vm0, %v3752_v7, %v1906_v51  ;;  %vm1967_vm6 = vweird.f32 %v3849_v19  ;;  %vm4480_vm7 = vcmp.gt.f32.partialorder %v3661_v30, 20.0  ;;  %v2148_v12 = vsel %vm3843_vm15, %v3800_v37, %v3794_v60  ;;  %v4523_v7 = vld [vmem:[#allocation35_spill] sm:$0xff] }
 0x2a4   : > { %v2197_v43 = vsel %vm4480_vm7, %v3661_v30, %v2157_v52  ;;  %v1891_v24 = vadd.f32 %v3714_v5, %v3808_v56  ;;  %v1963_v0 = vmul.f32 %v2742_v17, %v3849_v19  ;;  %vm3958_vm0 = vcmp.eq.f32.partialorder %v1971_v35, 8.507059e+37  ;;  %v4504_v56 = vld [vmem:[#allocation41_spill] sm:$0xff] }
 0x2a5   : > { %v1974_v4 = vor.u32 1.1754944e-38, %v1973_v38  ;;  %v2175_v30 = vsel %vm3871_vm14, %v2172_v46, %v2169_v27  ;;  %v1945_v60 = vsel %vm3852_vm1, %v3822_v28, %v1940_v61  ;;  %vm4483_vm15 = vweird.f32 %v3714_v5  ;;  %v2744_v13 = vpop.eup %2743 }
 0x2a6   : > { %vm4484_vm7 = vweird.f32 %v3670_v31  ;;  %vm3975_vm8 = vcmp.lt.f32.partialorder %v2182_v32, 0.0004427343  ;;  %vm4489_vm14 = vweird.f32 %v3791_v20  ;;  %v3987_v28 = vmul.f32 %v2197_v43, %v1930_v53 }
 0x2a7   : > { %vm3971_vm12 = vmor %vm4484_vm7, %vm4483_vm15  ;;  %v1915_v31 = vsel %vm3866_vm13, %v3749_v29, %v1910_v62  ;;  %v4492_v57 = vsub.f32 1.0, %v3747_v59  ;;  %v1964_v47 = vsub.f32 1.0, %v1963_v0  ;;  %v2181_v18 = vmul.f32 %v2738_v39, %v2180_v34  ;;  %v4499_v62 = vld [vmem:[#allocation42_spill] sm:$0xff] }
 0x2a8   : > { %vm3983_vm9 = vmor %vm4489_vm14, %vm1953_vm3  ;;  %v1895_v42 = vsel %vm3971_vm12, %v3714_v5, %v1891_v24  ;;  %v2178_v51 = vmul.f32 0.6931472, %v2744_v13  ;;  %v2199_v29 = vsel %vm1991_vm4, %v3739_v45, %v2175_v30  ;;  %v2214_v33 = vmul.f32 %v2198_v26, %v1945_v60 }
 0x2a9   : > { %v1875_v11 = vmul.f32 %v3717_v21, %v4492_v57  ;;  %v1955_v20 = vsel %vm3983_vm9, %v3847_v14, %v1951_v40  ;;  %v2196_v59 = vsel %vm1988_vm10, %v3634_v22, %v2148_v12  ;;  %v1965_v35 = vmul.f32 %v2742_v17, %v1964_v47 }
 0x2aa   : > { %vm1968_vm13 = vweird.f32 %v2742_v17  ;;  %v2139_v14 = vsel %vm3898_vm2, %v3743_v15, %v3776_v58  ;;  %v2122_v39 = vadd.f32 1.0, %v3723_v50  ;;  %v1960_v5 = vsel %vm3904_vm5, %v3862_v41, %v1955_v20 }
 0x2ab   : > { %v1900_v45 = vsel %vm3918_vm11, %v3733_v10, %v1895_v42  ;;  %v1876_v46 = vadd.f32 %v3717_v21, %v1875_v11  ;;  %vm1878_vm10 = vweird.f32 %v3717_v21  ;;  %v1966_v22 = vadd.f32 %v2742_v17, %v1965_v35  ;;  %vm1969_vm1 = vmor %vm1967_vm6, %vm1968_vm13 }
 0x2ac   : > { %v2184_v3 = vsel %vm3975_vm8, %v2181_v18, %v2178_v51  ;;  %2745 = vlog2.f32 %v2122_v39  ;;  %v2125_v15 = vmul.f32 -0.5, %v3723_v50  ;;  %v2212_v58 = vmul.f32 %v2196_v59, %v1915_v31  ;;  %v4507_v31 = vld [vmem:[#allocation30_spill] sm:$0xff]  ;;  %v4508_v51 = vld [vmem:[#allocation32_spill] sm:$0xff] }
 0x2ad   : > { %vm4493_vm4 = vcmp.gt.f32.partialorder %v3598_v44, 20.0  ;;  %v1883_v10 = vand.u32 2147483648, %v3678_v2  ;;  %v1858_v52 = vmul.f32 %v3708_v16, %v3666_v9  ;;  %v1970_v25 = vsel %vm1969_vm1, %v2742_v17, %v1966_v22 }
 0x2ae   : > { %v2195_v41 = vsel %vm4493_vm4, %v3598_v44, %v2139_v14  ;;  %v2215_v49 = vmul.f32 %v2199_v29, %v1960_v5  ;;  %vm4494_vm2 = vweird.f32 %v3678_v2  ;;  %v1881_v19 = vand.u32 2147483647, %v3678_v2  ;;  %v4509_v29 = vld [vmem:[#allocation40_spill] sm:$0xff]  ;;  %v4510_v14 = vld [vmem:[#allocation27_spill] sm:$0xff] }
 0x2af   : > { %v4031_v38 = vmul.f32 %v2195_v41, %v1900_v45  ;;  %vm4035_vm5 = vmor %vm4494_vm2, %vm1878_vm10  ;;  %v1975_v44 = vsel %vm3958_vm0, %v1974_v4, %v1970_v25  ;;  %vm4497_vm11 = vcmp.gt.f32.partialorder %v3782_v1, 20.0  ;;  %v1859_v48 = vsub.f32 1.0, %v1858_v52 }
 0x2b0   : > { %v2200_v27 = vsel %vm4497_vm11, %v3782_v1, %v2184_v3  ;;  %v1880_v6 = vsel %vm4035_vm5, %v3717_v21, %v1876_v46  ;;  %v2126_v32 = vadd.f32 1.0, %v2125_v15  ;;  %v2128_v61 = vand.u32 2147483647, %v3723_v50  ;;  %v4498_v1 = vld [vmem:[#allocation36_spill] sm:$0xff] }
 0x2b1   : > { %v2216_v23 = vmul.f32 %v2200_v27, %v1975_v44  ;;  %v2113_v26 = vadd.f32 1.0, %v3695_v8  ;;  %v1884_v54 = vor.u32 1.1754944e-38, %v1883_v10  ;;  %v1860_v2 = vmul.f32 %v3708_v16, %v1859_v48  ;;  %v4517_v48 = vld [vmem:[#allocation37_spill] sm:$0xff] }
 0x2b2   : > { %v1866_v34 = vand.u32 2147483647, %v3666_v9  ;;  %v2116_v40 = vmul.f32 -0.5, %v3695_v8  ;;  %v2746_v53 = vpop.eup %2745  ;;  %vm1882_vm3 = vcmp.eq.f32.partialorder %v1881_v19, 8.507059e+37  ;;  %vm1986_vm9 = vcmp.gt.f32.partialorder %v3646_v63, 20.0 }
 0x2b3   : > { %2235 = vmatpush.msra.mxu2 %v2216_v23  ;;  %v1868_v21 = vand.u32 2147483648, %v3666_v9  ;;  %2747 = vlog2.f32 %v2113_v26  ;;  %v1843_v17 = vmul.f32 %v4499_v62, %v4498_v1  ;;  %v1885_v43 = vsel %vm1882_vm3, %v1884_v54, %v1880_v6  ;;  %v4516_v6 = vld [vmem:[#allocation31_spill] sm:$0xff] }
 0x2b4   : > { %v1861_v12 = vadd.f32 %v3708_v16, %v1860_v2  ;;  %vm1862_vm6 = vweird.f32 %v3666_v9  ;;  %vm1863_vm12 = vweird.f32 %v3708_v16  ;;  %v2124_v24 = vmul.f32 0.6931472, %v2746_v53 }
 0x2b5   : > { %2236 = vmatpush.msra.mxu2 %v2215_v49  ;;  %v2127_v0 = vmul.f32 %v3723_v50, %v2126_v32  ;;  %vm4061_vm8 = vcmp.lt.f32.partialorder %v2128_v61, 0.0004427343  ;;  %v1844_v4 = vsub.f32 1.0, %v1843_v17  ;;  %vm4065_vm0 = vcmp.eq.f32.partialorder %v1866_v34, 8.507059e+37  ;;  %vm4071_vm15 = vmor %vm1862_vm6, %vm1863_vm12  ;;  %v4518_v34 = vld [vmem:[#allocation43_spill] sm:$0xff] }
 0x2b6   : > { %v2117_v60 = vadd.f32 1.0, %v2116_v40  ;;  %v2119_v37 = vand.u32 2147483647, %v3695_v8  ;;  %v2104_v9 = vadd.f32 1.0, %v4504_v56  ;;  %v1869_v50 = vor.u32 1.1754944e-38, %v1868_v21 }
 0x2b7   : > { %2237 = vmatpush.msra.mxu2 %v2214_v33  ;;  %vm1985_vm7 = vcmp.gt.f32.partialorder %v4507_v31, 20.0  ;;  %v1845_v57 = vmul.f32 %v4499_v62, %v1844_v4  ;;  %vm1847_vm14 = vweird.f32 %v4498_v1  ;;  %v1865_v11 = vsel %vm4071_vm15, %v3708_v16, %v1861_v12 }
 0x2b8   : > { %v1851_v13 = vand.u32 2147483647, %v4498_v1  ;;  %2749 = vlog2.f32 %v2104_v9  ;;  %v2107_v47 = vmul.f32 -0.5, %v4504_v56  ;;  %v2130_v20 = vsel %vm4061_vm8, %v2127_v0, %v2124_v24  ;;  %v4526_v9 = vld [vmem:[#allocation34_spill] sm:$0xff] }
 0x2b9   : > { %v2748_v18 = vpop.eup %2747  ;;  %2238 = vmatpush.msra.mxu2 %v3987_v28  ;;  %v1846_v42 = vadd.f32 %v4499_v62, %v1845_v57  ;;  %vm1848_vm13 = vweird.f32 %v4499_v62  ;;  %v1828_v33 = vmul.f32 %v4509_v29, %v4508_v51  ;;  %v2118_v16 = vmul.f32 %v3695_v8, %v2117_v60  ;;  %v4524_v60 = vld [vmem:[#allocation24_spill] sm:$0xff]  ;;  %v4535_v8 = vld [vmem:[#allocation29_spill] sm:$0xff] }
 0x2ba   : > { %v2115_v59 = vmul.f32 0.6931472, %v2748_v18  ;;  %vm2120_vm10 = vcmp.lt.f32.partialorder %v2119_v37, 0.0004427343  ;;  %v1853_v35 = vand.u32 2147483648, %v4498_v1  ;;  %v1870_v28 = vsel %vm4065_vm0, %v1869_v50, %v1865_v11  ;;  %vm4100_vm4 = vmor %vm1847_vm14, %vm1848_vm13 }
 0x2bb   : > { %2239 = vmatpush.msra.mxu2 %v2212_v58  ;;  %vm1984_vm1 = vcmp.gt.f32.partialorder %v4510_v14, 20.0  ;;  %v2108_v39 = vadd.f32 1.0, %v2107_v47  ;;  %v1829_v5 = vsub.f32 1.0, %v1828_v33  ;;  %v2194_v45 = vsel %vm1986_vm9, %v3646_v63, %v2130_v20 }
 0x2bc   : > { %v2121_v46 = vsel %vm2120_vm10, %v2118_v16, %v2115_v59  ;;  %vm4104_vm2 = vcmp.eq.f32.partialorder %v1851_v13, 8.507059e+37  ;;  %v2110_v3 = vand.u32 2147483647, %v4504_v56  ;;  %v2210_v15 = vmul.f32 %v2194_v45, %v1885_v43 }
 0x2bd   : > { %2240 = vmatpush.msra.mxu2 %v4031_v38  ;;  %v2193_v63 = vsel %vm1985_vm7, %v4507_v31, %v2121_v46  ;;  %v1850_v58 = vsel %vm4100_vm4, %v4499_v62, %v1846_v42  ;;  %v1830_v41 = vmul.f32 %v4509_v29, %v1829_v5  ;;  %v1854_v25 = vor.u32 1.1754944e-38, %v1853_v35  ;;  %v4531_v35 = vld [vmem:[#allocation33_spill] sm:$0xff]  ;;  %v4534_v46 = vld [vmem:[#allocation20_spill] sm:$0xff] }
 0x2be   : > { %v2750_v10 = vpop.eup %2749  ;;  %v2209_v52 = vmul.f32 %v2193_v63, %v1870_v28  ;;  %v1836_v49 = vand.u32 2147483647, %v4508_v51  ;;  %v2095_v19 = vadd.f32 1.0, %v4515_v55  ;;  %v2109_v44 = vmul.f32 %v4504_v56, %v2108_v39  ;;  %v4525_v56 = vld [vmem:[#allocation26_spill] sm:$0xff]  ;;  %v4549_v31 = vld [vmem:[#allocation25_spill] sm:$0xff] }
 0x2bf   : > { %2241 = vmatpush.msra.mxu2 %v2210_v15  ;;  %v2106_v38 = vmul.f32 0.6931472, %v2750_v10  ;;  %v2098_v27 = vmul.f32 -0.5, %v4515_v55  ;;  %v1813_v23 = vmul.f32 %v4517_v48, %v4516_v6  ;;  %v1855_v32 = vsel %vm4104_vm2, %v1854_v25, %v1850_v58  ;;  %v4536_v25 = vld [vmem:[#allocation18_spill] sm:$0xff] }
 0x2c0   : > { %vm2111_vm5 = vcmp.lt.f32.partialorder %v2110_v3, 0.0004427343  ;;  %v1838_v61 = vand.u32 2147483648, %v4508_v51  ;;  %2751 = vlog2.f32 %v2095_v19  ;;  %v1831_v54 = vadd.f32 %v4509_v29, %v1830_v41 }
 0x2c1   : > { %2242 = vmatpush.msra.mxu2 %v2209_v52  ;;  %v2112_v26 = vsel %vm2111_vm5, %v2109_v44, %v2106_v38  ;;  %vm1833_vm11 = vweird.f32 %v4509_v29  ;;  %v1814_v2 = vsub.f32 1.0, %v1813_v23  ;;  %2753 = vpow2.f32 %v4518_v34 }
 0x2c2   : > { %v2192_v40 = vsel %vm1984_vm1, %v4510_v14, %v2112_v26  ;;  %vm1832_vm3 = vweird.f32 %v4508_v51  ;;  %v2101_v53 = vand.u32 2147483647, %v4515_v55  ;;  %vm4134_vm9 = vcmp.eq.f32.partialorder %v1836_v49, 8.507059e+37 }
 0x2c3   : > { %v2208_v21 = vmul.f32 %v2192_v40, %v1855_v32  ;;  %v2099_v62 = vadd.f32 1.0, %v2098_v27  ;;  %v1815_v17 = vmul.f32 %v4517_v48, %v1814_v2  ;;  %vm4139_vm6 = vmor %vm1832_vm3, %vm1833_vm11  ;;  %v1839_v12 = vor.u32 1.1754944e-38, %v1838_v61 }
 0x2c4   : > { %v1821_v24 = vand.u32 2147483647, %v4516_v6  ;;  %v1823_v0 = vand.u32 2147483648, %v4516_v6  ;;  %v2086_v4 = vadd.f32 1.0, %v4523_v7  ;;  %v1835_v30 = vsel %vm4139_vm6, %v4509_v29, %v1831_v54 }
 0x2c5   : > { %2243 = vmatpush.msra.mxu2 %v2208_v21  ;;  %vm1983_vm12 = vcmp.gt.f32.partialorder %v4524_v60, 20.0  ;;  %v2089_v37 = vmul.f32 -0.5, %v4523_v7  ;;  %v1798_v36 = vmul.f32 %v4526_v9, %v4525_v56  ;;  %vm4153_vm8 = vcmp.lt.f32.partialorder %v2101_v53, 0.0004427343  ;;  %v4543_v53 = vld [vmem:[#allocation17_spill] sm:$0xff]  ;;  %v4544_v21 = vld [vmem:[#allocation28_spill] sm:$0xff] }
 0x2c6   : > { %v2752_v50 = vpop.eup %2751  ;;  %vm1817_vm0 = vweird.f32 %v4516_v6  ;;  %vm1818_vm15 = vweird.f32 %v4517_v48  ;;  %2755 = vlog2.f32 %v2086_v4  ;;  %v2100_v11 = vmul.f32 %v4515_v55, %v2099_v62 }
 0x2c7   : > { %v2097_v57 = vmul.f32 0.6931472, %v2752_v50  ;;  %v1816_v13 = vadd.f32 %v4517_v48, %v1815_v17  ;;  %v1799_v47 = vsub.f32 1.0, %v1798_v36  ;;  %v4161_v18 = vpop.eup %2753  ;;  %v1840_v20 = vsel %vm4134_vm9, %v1839_v12, %v1835_v30  ;;  %vm4181_vm14 = vmor %vm1817_vm0, %vm1818_vm15  ;;  %v4545_v30 = vld [vmem:[#allocation16_spill] sm:$0xff]  ;;  %v4548_v36 = vld [vmem:[#allocation39_spill] sm:$0xff] }
 0x2c8   : > { %vm4165_vm7 = vcmp.eq.f32.partialorder %v1821_v24, 8.507059e+37  ;;  %v1824_v51 = vor.u32 1.1754944e-38, %v1823_v0  ;;  %v2092_v29 = vand.u32 2147483647, %v4523_v7  ;;  %v2090_v59 = vadd.f32 1.0, %v2089_v37 }
 0x2c9   : > { %v2103_v33 = vsel %vm4153_vm8, %v2100_v11, %v2097_v57  ;;  %v1800_v16 = vmul.f32 %v4526_v9, %v1799_v47  ;;  %v2077_v28 = vadd.f32 1.0, %v4531_v35  ;;  %v1806_v5 = vand.u32 2147483647, %v4525_v56 }
 0x2ca   : > { %v2191_v14 = vsel %vm1983_vm12, %v4524_v60, %v2103_v33  ;;  %v2080_v45 = vmul.f32 -0.5, %v4531_v35  ;;  %v1783_v22 = vmul.f32 %v4535_v8, %v4534_v46  ;;  %v1820_v15 = vsel %vm4181_vm14, %v4517_v48, %v1816_v13  ;;  %v4553_v33 = vld [vmem:[#allocation23_spill] sm:$0xff] }
 0x2cb   : > { %v2207_v3 = vmul.f32 %v2191_v14, %v1840_v20  ;;  %v1808_v63 = vand.u32 2147483648, %v4525_v56  ;;  %2757 = vlog2.f32 %v2077_v28  ;;  %v1801_v41 = vadd.f32 %v4526_v9, %v1800_v16 }
 0x2cc   : > { %v2756_v58 = vpop.eup %2755  ;;  %vm1803_vm13 = vweird.f32 %v4526_v9  ;;  %v2083_v10 = vand.u32 2147483647, %v4531_v35  ;;  %v1784_v52 = vsub.f32 1.0, %v1783_v22  ;;  %vm1982_vm10 = vcmp.gt.f32.partialorder %v4536_v25, 20.0 }
 0x2cd   : > { %2244 = vmatpush.msra.mxu2 %v2207_v3  ;;  %v2088_v49 = vmul.f32 0.6931472, %v2756_v58  ;;  %v2091_v55 = vmul.f32 %v4523_v7, %v2090_v59  ;;  %vm1802_vm1 = vweird.f32 %v4525_v56  ;;  %v1825_v19 = vsel %vm4165_vm7, %v1824_v51, %v1820_v15 }
 0x2ce   : > { %vm2093_vm4 = vcmp.lt.f32.partialorder %v2092_v29, 0.0004427343  ;;  %v2081_v38 = vadd.f32 1.0, %v2080_v45  ;;  %v1785_v44 = vmul.f32 %v4535_v8, %v1784_v52  ;;  %vm4202_vm2 = vmor %vm1802_vm1, %vm1803_vm13  ;;  %vm4206_vm5 = vcmp.eq.f32.partialorder %v1806_v5, 8.507059e+37  ;;  %v4552_v29 = vld [vmem:[#allocation15_spill] sm:$0xff] }
 0x2cf   : > { %v2094_v27 = vsel %vm2093_vm4, %v2091_v55, %v2088_v49  ;;  %v1809_v23 = vor.u32 1.1754944e-38, %v1808_v63  ;;  %v2068_v32 = vadd.f32 1.0, %v4161_v18  ;;  %v1805_v26 = vsel %vm4202_vm2, %v4526_v9, %v1801_v41  ;;  %v4556_v41 = vld [vmem:[#allocation22_spill] sm:$0xff] }
 0x2d0   : > { %v2190_v61 = vsel %vm1982_vm10, %v4536_v25, %v2094_v27  ;;  %vm4215_vm11 = vcmp.lt.f32.partialorder %v2083_v10, 0.0004427343  ;;  %v2071_v2 = vmul.f32 -0.5, %v4161_v18  ;;  %vm1788_vm3 = vweird.f32 %v4535_v8  ;;  %v4557_v55 = vld [vmem:[#allocation14_spill] sm:$0xff] }
 0x2d1   : > { %v2758_v34 = vpop.eup %2757  ;;  %v2206_v40 = vmul.f32 %v2190_v61, %v1825_v19  ;;  %2759 = vlog2.f32 %v2068_v32  ;;  %v1768_v1 = vmul.f32 %v4544_v21, %v4543_v53  ;;  %v2082_v17 = vmul.f32 %v4531_v35, %v2081_v38  ;;  %v4558_v19 = vld [vmem:[#allocation21_spill] sm:$0xff] }
 0x2d2   : > { %v2079_v62 = vmul.f32 0.6931472, %v2758_v34  ;;  %v1786_v43 = vadd.f32 %v4535_v8, %v1785_v44  ;;  %v1791_v12 = vand.u32 2147483647, %v4534_v46  ;;  %v1810_v24 = vsel %vm4206_vm5, %v1809_v23, %v1805_v26  ;;  %v4559_v32 = vld [vmem:[#allocation13_spill] sm:$0xff] }
 0x2d3   : > { %2245 = vmatpush.msra.mxu2 %v2206_v40  ;;  %v1793_v0 = vand.u32 2147483648, %v4534_v46  ;;  %v2074_v7 = vand.u32 2147483647, %v4161_v18  ;;  %v1769_v4 = vsub.f32 1.0, %v1768_v1  ;;  %vm1981_vm9 = vcmp.gt.f32.partialorder %v4545_v30, 20.0  ;;  %v4560_v1 = vld [vmem:[#allocation19_spill] sm:$0xff] }
 0x2d4   : > { %v2085_v60 = vsel %vm4215_vm11, %v2082_v17, %v2079_v62  ;;  %vm1787_vm6 = vweird.f32 %v4534_v46  ;;  %v2072_v37 = vadd.f32 1.0, %v2071_v2  ;;  %vm1980_vm8 = vcmp.gt.f32.partialorder %v4548_v36, 20.0 }
 0x2d5   : > { %v2189_v56 = vsel %vm1981_vm9, %v4545_v30, %v2085_v60  ;;  %vm4237_vm12 = vmor %vm1787_vm6, %vm1788_vm3  ;;  %v1770_v50 = vmul.f32 %v4544_v21, %v1769_v4  ;;  %v2059_v57 = vadd.f32 1.0, %v4549_v31  ;;  %vm1792_vm0 = vcmp.eq.f32.partialorder %v1791_v12, 8.507059e+37  ;;  %v4561_v60 = vld [vmem:[#allocation12_spill] sm:$0xff] }
 0x2d6   : > { %v2205_v11 = vmul.f32 %v2189_v56, %v1810_v24  ;;  %v1790_v13 = vsel %vm4237_vm12, %v4535_v8, %v1786_v43  ;;  %v2062_v47 = vmul.f32 -0.5, %v4549_v31  ;;  %v1794_v42 = vor.u32 1.1754944e-38, %v1793_v0 }
 0x2d7   : > { %v2760_v20 = vpop.eup %2759  ;;  %vm4248_vm15 = vcmp.lt.f32.partialorder %v2074_v7, 0.0004427343  ;;  %2761 = vlog2.f32 %v2059_v57  ;;  %v1753_v59 = vmul.f32 %v4553_v33, %v4552_v29  ;;  %v2073_v35 = vmul.f32 %v4161_v18, %v2072_v37 }
 0x2d8   : > { %2246 = vmatpush.msra.mxu2 %v2205_v11  ;;  %v2070_v16 = vmul.f32 0.6931472, %v2760_v20  ;;  %v1771_v28 = vadd.f32 %v4544_v21, %v1770_v50  ;;  %vm1773_vm7 = vweird.f32 %v4544_v21  ;;  %v1795_v14 = vsel %vm1792_vm0, %v1794_v42, %v1790_v13 }
 0x2d9   : > { %v1776_v39 = vand.u32 2147483647, %v4543_v53  ;;  %v1778_v5 = vand.u32 2147483648, %v4543_v53  ;;  %v1754_v45 = vsub.f32 1.0, %v1753_v59  ;;  %vm1772_vm14 = vweird.f32 %v4543_v53 }
 0x2da   : > { %v2076_v46 = vsel %vm4248_vm15, %v2073_v35, %v2070_v16  ;;  %v2063_v8 = vadd.f32 1.0, %v2062_v47  ;;  %v2065_v22 = vand.u32 2147483647, %v4549_v31  ;;  %vm4266_vm13 = vmor %vm1772_vm14, %vm1773_vm7  ;;  %v2050_v10 = vadd.f32 1.0, %v4556_v41  ;;  %v4563_v16 = vld [vmem:[#allocation11_spill] sm:$0xff] }
 0x2db   : > { %v2188_v18 = vsel %vm1980_vm8, %v4548_v36, %v2076_v46  ;;  %v1755_v15 = vmul.f32 %v4553_v33, %v1754_v45  ;;  %v1775_v58 = vsel %vm4266_vm13, %v4544_v21, %v1771_v28  ;;  %vm1777_vm10 = vcmp.eq.f32.partialorder %v1776_v39, 8.507059e+37  ;;  %v2232_v46 = vld [vmem:[#allocation6] sm:$0xff] }
 0x2dc   : > { %v2204_v63 = vmul.f32 %v2188_v18, %v1795_v14  ;;  %v1779_v25 = vor.u32 1.1754944e-38, %v1778_v5  ;;  %v2053_v49 = vmul.f32 -0.5, %v4556_v41  ;;  %v1738_v38 = vmul.f32 %v4558_v19, %v4557_v55  ;;  %v2233_v18 = vld [vmem:[#allocation6 + $0x8] sm:$0xff] }
 0x2dd   : > { %v2762_v52 = vpop.eup %2761  ;;  %v2064_v27 = vmul.f32 %v4549_v31, %v2063_v8  ;;  %vm2066_vm1 = vcmp.lt.f32.partialorder %v2065_v22, 0.0004427343  ;;  %2763 = vlog2.f32 %v2050_v10  ;;  %v1756_v48 = vadd.f32 %v4553_v33, %v1755_v15 }
 0x2de   : > { %2247 = vmatpush.msra.mxu2 %v2204_v63  ;;  %v2061_v44 = vmul.f32 0.6931472, %v2762_v52  ;;  %v1780_v6 = vsel %vm1777_vm10, %v1779_v25, %v1775_v58  ;;  %vm1758_vm4 = vweird.f32 %v4553_v33  ;;  %v1739_v23 = vsub.f32 1.0, %v1738_v38  ;;  %v2234_v63 = vld [vmem:[#allocation6 + $0x10] sm:$0xff] }
 0x2df   : > { %vm1979_vm2 = vcmp.gt.f32.partialorder %v4559_v32, 20.0  ;;  %v1761_v26 = vand.u32 2147483647, %v4552_v29  ;;  %v1763_v54 = vand.u32 2147483648, %v4552_v29  ;;  %vm1757_vm5 = vweird.f32 %v4552_v29 }
 0x2e0   : > { %v2067_v61 = vsel %vm2066_vm1, %v2064_v27, %v2061_v44  ;;  %v2054_v34 = vadd.f32 1.0, %v2053_v49  ;;  %v1740_v40 = vmul.f32 %v4558_v19, %v1739_v23  ;;  %vm1759_vm11 = vmor %vm1757_vm5, %vm1758_vm4  ;;  %v2056_v21 = vand.u32 2147483647, %v4556_v41 }
 0x2e1   : > { %v2187_v2 = vsel %vm1979_vm2, %v4559_v32, %v2067_v61  ;;  %v2041_v62 = vadd.f32 1.0, %v4560_v1  ;;  %v1760_v17 = vsel %vm1759_vm11, %v4553_v33, %v1756_v48  ;;  %v2044_v43 = vmul.f32 -0.5, %v4560_v1  ;;  %v2638_v33 = vld [vmem:[%s588_s0] ss:$0 sm:$0xff] }
 0x2e2   : > { %v2203_v53 = vmul.f32 %v2187_v2, %v1780_v6  ;;  %vm1762_vm3 = vcmp.eq.f32.partialorder %v1761_v26, 8.507059e+37  ;;  %v1764_v24 = vor.u32 1.1754944e-38, %v1763_v54  ;;  %v2055_v7 = vmul.f32 %v4556_v41, %v2054_v34 }
 0x2e3   : > { %v2764_v12 = vpop.eup %2763  ;;  %2765 = vlog2.f32 %v2041_v62  ;;  %v1741_v4 = vadd.f32 %v4558_v19, %v1740_v40  ;;  %vm1743_vm9 = vweird.f32 %v4558_v19  ;;  %vm1978_vm6 = vcmp.gt.f32.partialorder %v4561_v60, 20.0 }
 0x2e4   : > { %2248 = vmatpush.msra.mxu2 %v2203_v53  ;;  %v2052_v0 = vmul.f32 0.6931472, %v2764_v12  ;;  %v1765_v30 = vsel %vm1762_vm3, %v1764_v24, %v1760_v17  ;;  %vm2057_vm12 = vcmp.lt.f32.partialorder %v2056_v21, 0.0004427343  ;;  %v1748_v37 = vand.u32 2147483648, %v4557_v55 }
 0x2e5   : > { %vm1742_vm8 = vweird.f32 %v4557_v55  ;;  %v1746_v9 = vand.u32 2147483647, %v4557_v55  ;;  %v2045_v36 = vadd.f32 1.0, %v2044_v43  ;;  %v2047_v31 = vand.u32 2147483647, %v4560_v1 }
 0x2e6   : > { %v2058_v56 = vsel %vm2057_vm12, %v2055_v7, %v2052_v0  ;;  %vm1744_vm0 = vmor %vm1742_vm8, %vm1743_vm9  ;;  %v1749_v47 = vor.u32 1.1754944e-38, %v1748_v37  ;;  %v4562_v51 = vlaneseq  ;;  %vm1977_vm14 = vcmp.gt.f32.partialorder %v4563_v16, 20.0 }
 0x2e7   : > { %v2186_v50 = vsel %vm1978_vm6, %v4561_v60, %v2058_v56  ;;  %v1745_v11 = vsel %vm1744_vm0, %v4558_v19, %v1741_v4  ;;  %vm1747_vm15 = vcmp.eq.f32.partialorder %v1746_v9, 8.507059e+37  ;;  %v2046_v42 = vmul.f32 %v4560_v1, %v2045_v36 }
 0x2e8   : > { %v2202_v57 = vmul.f32 %v2186_v50, %v1765_v30  ;;  %v2218_v29 = vshrl.u32 %v4562_v51, 7  ;;  %v1750_v59 = vsel %vm1747_vm15, %v1749_v47, %v1745_v11  ;;  %vm2048_vm7 = vcmp.lt.f32.partialorder %v2047_v31, 0.0004427343 }
 0x2e9   : > { %v2766_v13 = vpop.eup %2765  ;;  %v2824_v39 = vmov 1.0   ;;  %vm2264_vm4 = vcmask 523264  }
 0x2ea   : > { %2249 = vmatpush.msra.mxu2 %v2202_v57  ;;  %v2043_v20 = vmul.f32 0.6931472, %v2766_v13  ;;  %vm2223_vm13 = vcmp.eq.s32.totalorder %v2638_v33, %v2218_v29  ;;  %v2219_v5 = vadd.s32 8, %v2218_v29  ;;  %v2220_v45 = vadd.s32 16, %v2218_v29 }
 0x2ec   : > { %v2049_v35 = vsel %vm2048_vm7, %v2046_v42, %v2043_v20  ;;  %vm2224_vm10 = vcmp.eq.s32.totalorder %v2638_v33, %v2219_v5  ;;  %vm2225_vm1 = vcmp.eq.s32.totalorder %v2638_v33, %v2220_v45 }
 0x2ed   : > { %v2185_v28 = vsel %vm1977_vm14, %v4563_v16, %v2049_v35 }
 0x2ee   : > { %v2201_v14 = vmul.f32 %v2185_v28, %v1750_v59 }
 0x2f0   : > { %2250 = vmatpush.msra.mxu2 %v2201_v14 }
 0x2f1   : > { %2593 = vmatmul.msk.f32.vlgmr.msra.gmra.mxu2 %vm2223_vm13, %v2824_v39 }
 0x2f9   : > { %2594 = vmatmul.msk.f32.gmra.mxu2 %vm2224_vm10, %v2824_v39 }
 0x301   : > { %2595 = vmatmul.msk.f32.gmra.mxu2 %vm2225_vm1, %v2824_v39 }
 0x374   : > { %v2252_v8 = vpop.f32.mrf.mxu2 }
 0x375   : > { %v2261_v22 = vadd.f32 %v2252_v8, %v2232_v46 }
 0x377   : > { %2265 = vst.msk [vmem:[#allocation6] sm:$0xff] %vm2264_vm4, %v2261_v22 }
 0x37c   : > { %v2255_v3 = vpop.f32.mrf.mxu2 }
 0x37d   : > { %v2262_v15 = vadd.f32 %v2255_v3, %v2233_v18 }
 0x37f   : > { %2266 = vst.msk [vmem:[#allocation6 + $0x8] sm:$0xff] %vm2264_vm4, %v2262_v15 }
 0x383   : > { %2271 = sbr.rel (%p2596_p6) target bundleno = 942 (0x3ae), region = 96 }
 0x384   : > { %v2258_v58 = vpop.f32.mrf.mxu2 }
 0x385   : > { %v2263_v41 = vadd.f32 %v2258_v58, %v2234_v63 }
 0x387   : > { %2267 = vst.msk [vmem:[#allocation6 + $0x10] sm:$0xff] %vm2264_vm4, %v2263_v41 }
 0x388   : > { %v2272_v10 = vld [vmem:[#allocation6] sm:$0xff]  ;;  %v2273_v55 = vld [vmem:[#allocation6 + $0x8] sm:$0xff]  ;;  %v2291_v23 = vld [vmem:[%s4342_s3 + $0x10] sm:$0xff] }
 0x389   : > { %v2767_v52 = vld [vmem:[%s4564_s17] ss:$0 sm:$0xff]  ;;  %v2290_v48 = vld [vmem:[%s4342_s3 + $0x8] sm:$0xff] }
 0x38a   : > { %v2768_v25 = vld [vmem:[%s4565_s24] ss:$0 sm:$0xff]  ;;  %v2279_v49 = vmul.f32 %v2767_v52, %v2272_v10  ;;  %v2280_v44 = vmul.f32 %v2767_v52, %v2273_v55 }
 0x38b   : > { %v2289_v38 = vld [vmem:[%s4342_s3] sm:$0xff] }
 0x38c   : > { %v2286_v6 = vadd.f32 %v2768_v25, %v2279_v49  ;;  %v2287_v32 = vadd.f32 %v2768_v25, %v2280_v44 }
 0x38e   : > { %v2274_v19 = vld [vmem:[#allocation6 + $0x10] sm:$0xff]  ;;  %v2292_v26 = vadd.f32 %v2289_v38, %v2286_v6  ;;  %v2293_v54 = vadd.f32 %v2290_v48, %v2287_v32 }
 0x38f   : > { %v2281_v27 = vmul.f32 %v2767_v52, %v2274_v19 }
 0x390   : > { %v2298_v34 = vmin.f32 %v2292_v26, 20.0  ;;  %v2299_v40 = vmin.f32 %v2293_v54, 20.0  ;;  %vm2295_vm5 = vcmp.gt.f32.partialorder %v2292_v26, 20.0  ;;  %vm2296_vm3 = vcmp.gt.f32.partialorder %v2293_v54, 20.0 }
 0x391   : > { %v2288_v61 = vadd.f32 %v2768_v25, %v2281_v27 }
 0x392   : > { %v2301_v21 = vmul.f32 1.442695, %v2298_v34  ;;  %v2303_v1 = vmul.f32 1.442695, %v2299_v40 }
 0x393   : > { %v2294_v2 = vadd.f32 %v2291_v23, %v2288_v61 }
 0x394   : > { %2769 = vpow2.f32 %v2301_v21 }
 0x395   : > { %v2300_v53 = vmin.f32 %v2294_v2, 20.0  ;;  %2771 = vpow2.f32 %v2303_v1  ;;  %vm2297_vm6 = vcmp.gt.f32.partialorder %v2294_v2, 20.0 }
 0x397   : > { %v2305_v62 = vmul.f32 1.442695, %v2300_v53 }
 0x399   : > { %2773 = vpow2.f32 %v2305_v62 }
 0x39a   : > { %v2770_v17 = vpop.eup %2769 }
 0x39b   : > { %v2772_v43 = vpop.eup %2771  ;;  %v2307_v12 = vadd.f32 1.0, %v2770_v17  ;;  %v2310_v24 = vmul.f32 -0.5, %v2770_v17  ;;  %v2313_v56 = vand.u32 2147483647, %v2770_v17 }
 0x39c   : > { %v2316_v7 = vadd.f32 1.0, %v2772_v43  ;;  %v2319_v4 = vmul.f32 -0.5, %v2772_v43  ;;  %v2322_v36 = vand.u32 2147483647, %v2772_v43 }
 0x39d   : > { %2775 = vlog2.f32 %v2307_v12  ;;  %v2311_v60 = vadd.f32 1.0, %v2310_v24  ;;  %vm2314_vm2 = vcmp.lt.f32.partialorder %v2313_v56, 0.0004427343 }
 0x39e   : > { %2777 = vlog2.f32 %v2316_v7  ;;  %v2320_v9 = vadd.f32 1.0, %v2319_v4  ;;  %vm2323_vm11 = vcmp.lt.f32.partialorder %v2322_v36, 0.0004427343 }
 0x39f   : > { %v2774_v0 = vpop.eup %2773  ;;  %v2312_v57 = vmul.f32 %v2770_v17, %v2311_v60 }
 0x3a0   : > { %v2325_v30 = vadd.f32 1.0, %v2774_v0  ;;  %v2328_v37 = vmul.f32 -0.5, %v2774_v0  ;;  %v2331_v31 = vand.u32 2147483647, %v2774_v0  ;;  %v2321_v13 = vmul.f32 %v2772_v43, %v2320_v9 }
 0x3a2   : > { %2779 = vlog2.f32 %v2325_v30  ;;  %v2329_v50 = vadd.f32 1.0, %v2328_v37  ;;  %vm2332_vm9 = vcmp.lt.f32.partialorder %v2331_v31, 0.0004427343 }
 0x3a3   : > { %v2776_v11 = vpop.eup %2775 }
 0x3a4   : > { %v2778_v47 = vpop.eup %2777  ;;  %v2309_v20 = vmul.f32 0.6931472, %v2776_v11  ;;  %v2330_v42 = vmul.f32 %v2774_v0, %v2329_v50 }
 0x3a5   : > { %v2318_v29 = vmul.f32 0.6931472, %v2778_v47 }
 0x3a6   : > { %v2315_v33 = vsel %vm2314_vm2, %v2312_v57, %v2309_v20 }
 0x3a7   : > { %v2334_v16 = vsel %vm2295_vm5, %v2292_v26, %v2315_v33  ;;  %v2324_v35 = vsel %vm2323_vm11, %v2321_v13, %v2318_v29 }
 0x3a8   : > { %v2780_v51 = vpop.eup %2779  ;;  %2337 = vst.msk [vmem:[#allocation7] sm:$0xff] %vm2264_vm4, %v2334_v16  ;;  %v2335_v28 = vsel %vm2296_vm3, %v2293_v54, %v2324_v35 }
 0x3a9   : > { %v2327_v59 = vmul.f32 0.6931472, %v2780_v51  ;;  %2338 = vst.msk [vmem:[#allocation7 + $0x8] sm:$0xff] %vm2264_vm4, %v2335_v28 }
 0x3ab   : > { %v2333_v14 = vsel %vm2332_vm9, %v2330_v42, %v2327_v59 }
 0x3ac   : > { %v2336_v39 = vsel %vm2297_vm6, %v2294_v2, %v2333_v14 }
 0x3ad   : > { %2339 = vst.msk [vmem:[#allocation7 + $0x10] sm:$0xff] %vm2264_vm4, %v2336_v39 }
 0x3ae PF: > { %p2614_p7 = scmp.eq.s32.totalorder %s2924_s25, 1  ;;  %s2825_s29 = smov [#allocation7]  }
 0x3af   : > { %s2345_s18 = sshll.u32 %s2825_s29, 4  ;;  %s4566_s16 = sld [smem:[#allocation48_spill]]  ;;  %s2346_s18 = int_to_ptr.vmem [resolvable:$true] %s2345_s18 }
 0x3b0   : > { %s2826_s0 = smov 128   ;;  %s2827_s17 = smov 8  }
 0x3b5   : > { %s2347_s27 = sshll.u32 %s4566_s16, 4  ;;  %s2348_s27 = int_to_ptr.hbm [resolvable:$true] %s2347_s27 }
 0x3b6   : > { %2611 = dma.vmem_to_hbm [thread:$0]  (%p2614_p7), %s2346_s18, 384, %s2348_s27, [#allocation8], %s2826_s0, %s2826_s0, %s2827_s17  }
 0x3b7   : > { %2814 = dma.done.wait (%p2614_p7), [#allocation8], 384  }
 0x3b8   : > { %2816 = vsyncadd (%p2614_p7), [#allocation8], 4294966912 }
 0x3b9 PF: > { %s4567_s30 = sld [smem:[#allocation10_spill]] }
 0x3bf   : > { %s28_s24 = sadd.s32 1, %s4567_s30  }
 0x3c0   : > { %p25_p8 = scmp.ge.s32.totalorder %s28_s24, 4  }
 0x3c2   :  { %27 = sbr.rel (!%p25_p8) target bundleno = 7 (0x7), region = 132 }
 0x3c7   :  { %2364 = vsyncpa [#allocation8], 1 }
 0x3c8   :  { %2366 = vsyncpa [#allocation8 + $0x1], 1 }

</bundles_post_ra>
